<compile_context>
chip_gen: v7x
topology: tpu7x:2x2x1
jax: 0.10.0
libtpu: 0.0.40
codegen_flags: <defaults>
</compile_context>

<pallas_src>
import jax
import jax.numpy as jnp
from jax.experimental import pallas as pl
from jax.experimental.pallas import tpu as pltpu


def _rep_spec(shape):
    """Replicated (grid-invariant) full-block spec for weights/biases."""
    nd = len(shape)
    return pl.BlockSpec(shape, lambda b, v, _nd=nd: (0,) * _nd)


# ----------------------------------------------------------------------------
# Fused kernel.  Grid = (batch_tiles, vocab_tiles).
#   block inputs : xe (TB,S,E) bf16, lens (TB,1) i32, eps (TB,L) f32
#   weights      : encoder / per-gate GRU / decoder pieces (bf16 mats, f32 bias)
#   block outputs: dec (TB*S, VT) f32, mu (TB,L) f32, log_sigma (TB,L) f32
#   scratch      : h1d (TB*S, H) bf16  -- decoder layer-1 activations, carried
#                  across the vocab axis.
# ----------------------------------------------------------------------------
def fused_svae_kernel(xe_ref, lens_ref, eps_ref,
                      ew1_ref, eb1_ref, ew2mu_ref, eb2mu_ref, ew2ls_ref, eb2ls_ref,
                      wih_r_ref, wih_z_ref, wih_n_ref,
                      whh_r_ref, whh_z_ref, whh_n_ref,
                      b_r_ref, b_z_ref, b_in_ref, b_hn_ref,
                      dw1r_ref, dw1z_ref, db1_ref, dw2_ref, db2_ref,
                      dec_ref, mu_ref, ls_ref,
                      h1_scratch):
    TB, S, E = xe_ref.shape
    R = whh_r_ref.shape[0]
    Hd = dw1r_ref.shape[1]
    v_idx = pl.program_id(1)

    # ---- Heavy per-batch-tile work only on the first vocab tile -------------
    @pl.when(v_idx == 0)
    def _compute_states():
        xe = xe_ref[...]                                         # (TB,S,E) bf16

        # Encoder: sum of first S-1 embedded items, 2-layer MLP (tanh hidden).
        # (matches reference: x_embed[:, :seqlen-1, :].sum(1), no length mask)
        x_pre = jnp.sum(xe[:, :S - 1, :].astype(jnp.float32), axis=1)   # (TB,E) f32
        h1e = jnp.tanh(jnp.dot(x_pre.astype(jnp.bfloat16), ew1_ref[...],
                               preferred_element_type=jnp.float32) + eb1_ref[...])
        h1e_b = h1e.astype(jnp.bfloat16)
        mu = jnp.dot(h1e_b, ew2mu_ref[...],
                     preferred_element_type=jnp.float32) + eb2mu_ref[...]
        log_sigma = jnp.dot(h1e_b, ew2ls_ref[...],
                            preferred_element_type=jnp.float32) + eb2ls_ref[...]
        mu_ref[...] = mu
        ls_ref[...] = log_sigma
        z = mu + jnp.exp(log_sigma) * eps_ref[...]               # (TB,L) f32

        # GRU input projections, hoisted out of the recurrence, one dot per
        # gate (lane-aligned: each result is a full (TB*S, R) tile, no 3R
        # sub-vreg slicing).  Input+hidden biases pre-folded for r/z.
        xe_flat = xe.reshape(TB * S, E)
        gx_r = (jnp.dot(xe_flat, wih_r_ref[...], preferred_element_type=jnp.float32)
                + b_r_ref[...]).reshape(TB, S, R)
        gx_z = (jnp.dot(xe_flat, wih_z_ref[...], preferred_element_type=jnp.float32)
                + b_z_ref[...]).reshape(TB, S, R)
        gx_n = (jnp.dot(xe_flat, wih_n_ref[...], preferred_element_type=jnp.float32)
                + b_in_ref[...]).reshape(TB, S, R)

        whh_r = whh_r_ref[...]
        whh_z = whh_z_ref[...]
        whh_n = whh_n_ref[...]
        b_hn = b_hn_ref[...]                                     # (1,R) f32

        # Hoisted validity masks (pack/pad semantics), one compare for all t.
        t_iota = jax.lax.broadcasted_iota(jnp.int32, (TB, S), 1)
        valid_all = lens_ref[...] > t_iota                       # (TB,S) bool

        # Serial GRU: hidden carried in vregs, static unroll, f32 gate math.
        h = jnp.zeros((TB, R), jnp.float32)
        outs = []
        for t in range(S):
            hb = h.astype(jnp.bfloat16)
            gh_r = jnp.dot(hb, whh_r, preferred_element_type=jnp.float32)
            gh_z = jnp.dot(hb, whh_z, preferred_element_type=jnp.float32)
            gh_n = jnp.dot(hb, whh_n, preferred_element_type=jnp.float32)
            r = jax.nn.sigmoid(gx_r[:, t, :] + gh_r)
            u = jax.nn.sigmoid(gx_z[:, t, :] + gh_z)
            n = jnp.tanh(gx_n[:, t, :] + r * (gh_n + b_hn))
            h_new = (1.0 - u) * n + u * h
            valid = valid_all[:, t:t + 1]                        # (TB,1) bool
            h = jnp.where(valid, h_new, h)                       # freeze padded rows
            outs.append(jnp.where(valid, h_new, 0.0))            # pad_packed -> zeros

        rnn_flat = jnp.stack(outs, axis=1).reshape(TB * S, R).astype(jnp.bfloat16)

        # Decoder layer 1: tanh(rnn @ W1_rnn + z @ W1_z + b1), stashed (bf16)
        # for all vocab tiles.  z-path + bias folded to one (TB,H) row term.
        zc = jnp.dot(z.astype(jnp.bfloat16), dw1z_ref[...],
                     preferred_element_type=jnp.float32) + db1_ref[...]      # (TB,Hd)
        u1 = jnp.dot(rnn_flat, dw1r_ref[...],
                     preferred_element_type=jnp.float32).reshape(TB, S, Hd)
        h1d = jnp.tanh(u1 + zc[:, None, :])                      # (TB,S,Hd) f32
        h1_scratch[...] = h1d.reshape(TB * S, Hd).astype(jnp.bfloat16)

    # ---- Decoder layer 2 for this vocab tile (lane-dense logits store) ------
    dec_ref[...] = (jnp.dot(h1_scratch[...], dw2_ref[...],
                            preferred_element_type=jnp.float32) + db2_ref[...])


# ----------------------------------------------------------------------------
# Parameter preparation (once, outside jit): per-gate GRU weights, folded
# biases, split encoder/decoder output layers, bf16 MXU operands / f32 biases.
# ----------------------------------------------------------------------------
def prepare_params(raw, compute_dtype=jnp.bfloat16):
    L = raw['enc_w2'].shape[1] // 2
    R = raw['gru_whh'].shape[-1]
    cd = compute_dtype

    w_ir, w_iz, w_in = raw['gru_wih'][0], raw['gru_wih'][1], raw['gru_wih'][2]
    w_hr, w_hz, w_hn = raw['gru_whh'][0], raw['gru_whh'][1], raw['gru_whh'][2]
    b_ir, b_iz, b_in = raw['gru_bih'][0], raw['gru_bih'][1], raw['gru_bih'][2]
    b_hr, b_hz, b_hn = raw['gru_bhh'][0], raw['gru_bhh'][1], raw['gru_bhh'][2]

    return dict(
        item_embed=raw['item_embed'].astype(cd),
        enc_w1=raw['enc_w1'].astype(cd), enc_b1=raw['enc_b1'].astype(jnp.float32),
        enc_w2_mu=raw['enc_w2'][:, :L].astype(cd),
        enc_b2_mu=raw['enc_b2'][:, :L].astype(jnp.float32),
        enc_w2_ls=raw['enc_w2'][:, L:].astype(cd),
        enc_b2_ls=raw['enc_b2'][:, L:].astype(jnp.float32),
        gru_wih_r=w_ir.astype(cd), gru_wih_z=w_iz.astype(cd), gru_wih_n=w_in.astype(cd),
        gru_whh_r=w_hr.astype(cd), gru_whh_z=w_hz.astype(cd), gru_whh_n=w_hn.astype(cd),
        gru_b_r=(b_ir + b_hr).astype(jnp.float32),
        gru_b_z=(b_iz + b_hz).astype(jnp.float32),
        gru_b_in=b_in.astype(jnp.float32),
        gru_b_hn=b_hn.astype(jnp.float32),
        # dec_in = concat(rnn_out, z): rows 0:R of dec_w1 hit rnn, rows R: hit z
        dec_w1_rnn=raw['dec_w1'][:R].astype(cd),
        dec_w1_z=raw['dec_w1'][R:].astype(cd),
        dec_b1=raw['dec_b1'].astype(jnp.float32),
        dec_w2=raw['dec_w2'].astype(cd),
        dec_b2=raw['dec_b2'].astype(jnp.float32),
    )


# ----------------------------------------------------------------------------
# ModelPE forward.  Returns (dec_out (B,S,V), z_mu (B*S,L), z_log_sigma (B*S,L)).
# ----------------------------------------------------------------------------
def model_pe_forward(fp, x, x_lens, eps, *, batch_tile=None, vocab_tile=None):
    B, S = x.shape
    L = eps.shape[1]
    E = fp['item_embed'].shape[1]
    R = fp['gru_whh_r'].shape[0]
    He = fp['enc_w1'].shape[1]
    Hd = fp['dec_w1_rnn'].shape[1]
    V = fp['dec_w2'].shape[1]

    TB = batch_tile if batch_tile is not None else min(B, 128)
    VT = vocab_tile if vocab_tile is not None else min(V, 512)
    assert B % TB == 0 and V % VT == 0

    # nn.Embedding lookup (gather) -- plain-JAX glue outside the kernel (bf16).
    x_embed = jnp.take(fp['item_embed'], x, axis=0)              # (B, S, E)
    lens2d = x_lens.astype(jnp.int32).reshape(B, 1)

    grid = (B // TB, V // VT)

    weight_names = ['enc_w1', 'enc_b1', 'enc_w2_mu', 'enc_b2_mu',
                    'enc_w2_ls', 'enc_b2_ls',
                    'gru_wih_r', 'gru_wih_z', 'gru_wih_n',
                    'gru_whh_r', 'gru_whh_z', 'gru_whh_n',
                    'gru_b_r', 'gru_b_z', 'gru_b_in', 'gru_b_hn',
                    'dec_w1_rnn', 'dec_w1_z', 'dec_b1']

    in_specs = ([pl.BlockSpec((TB, S, E), lambda b, v: (b, 0, 0)),   # x_embed
                 pl.BlockSpec((TB, 1), lambda b, v: (b, 0)),         # lens
                 pl.BlockSpec((TB, L), lambda b, v: (b, 0))]         # eps
                + [_rep_spec(fp[n].shape) for n in weight_names]
                + [pl.BlockSpec((Hd, VT), lambda b, v: (0, v)),      # dec_w2 (V-tiled)
                   pl.BlockSpec((1, VT), lambda b, v: (0, v))])      # dec_b2 (V-tiled)

    out_specs = (pl.BlockSpec((TB * S, VT), lambda b, v: (b, v)),    # logits
                 pl.BlockSpec((TB, L), lambda b, v: (b, 0)),         # mu
                 pl.BlockSpec((TB, L), lambda b, v: (b, 0)))         # log_sigma

    # Advisory cost estimate so XLA schedules the gather / loss around us.
    flops = (2 * B * E * He + 2 * B * He * 2 * L                    # encoder
             + 2 * B * S * E * 3 * R + 2 * B * S * R * 3 * R        # GRU
             + 2 * B * L * Hd + 2 * B * S * R * Hd + 2 * B * S * Hd * V)  # decoder
    transcendentals = B * He + B * L + B * S * 3 * R + B * S * Hd
    def _nbytes(a):
        return int(a.size) * a.dtype.itemsize
    bytes_accessed = (_nbytes(x_embed) + _nbytes(lens2d) + _nbytes(eps)
                      + sum(_nbytes(fp[n]) for n in weight_names)
                      + _nbytes(fp['dec_w2']) + _nbytes(fp['dec_b2'])
                      + B * S * V * 4 + 2 * B * L * 4)

    dec_flat, mu, log_sigma = pl.pallas_call(
        fused_svae_kernel,
        out_shape=(jax.ShapeDtypeStruct((B * S, V), jnp.float32),
                   jax.ShapeDtypeStruct((B, L), jnp.float32),
                   jax.ShapeDtypeStruct((B, L), jnp.float32)),
        grid=grid,
        in_specs=in_specs,
        out_specs=out_specs,
        scratch_shapes=[pltpu.VMEM((TB * S, Hd), jnp.bfloat16)],
        compiler_params=pltpu.CompilerParams(
            dimension_semantics=("parallel", "arbitrary"),
            vmem_limit_bytes=32 * 1024 * 1024),
        cost_estimate=pl.CostEstimate(flops=flops,
                                      transcendentals=transcendentals,
                                      bytes_accessed=bytes_accessed),
    )(x_embed, lens2d, eps,
      *[fp[n] for n in weight_names],
      fp['dec_w2'], fp['dec_b2'])

    dec_out = dec_flat.reshape(B, S, V)
    # Match reference API: stats replicated per timestep (cheap XLA broadcast).
    z_mu = jnp.broadcast_to(mu[:, None, :], (B, S, L)).reshape(B * S, L)
    z_log_sigma = jnp.broadcast_to(log_sigma[:, None, :], (B, S, L)).reshape(B * S, L)
    return dec_out, z_mu, z_log_sigma


if __name__ == "__main__":
    # Small, forward-consistent hyper-params (scaled-down from svae.py).
    B, S = 2, 8
    V = 128          # total_items
    E = 32           # item_embed_size
    H = 32           # hidden_size
    L = 16           # latent_size
    R = 32           # rnn_size

    key = jax.random.PRNGKey(0)
    ks = jax.random.split(key, 12)

    def xavier(k, din, dout):
        std = (2.0 / (din + dout)) ** 0.5
        return std * jax.random.normal(k, (din, dout), jnp.float32)

    raw_params = dict(
        item_embed=jax.random.normal(ks[0], (V + 1, E), jnp.float32),
        # encoder: (E -> H -> 2L), weights stored (in, out)
        enc_w1=xavier(ks[1], E, H),
        enc_b1=0.01 * jnp.ones((1, H), jnp.float32),
        enc_w2=xavier(ks[2], H, 2 * L),
        enc_b2=jnp.zeros((1, 2 * L), jnp.float32),
        # decoder: (R + L -> H -> V), concat order (rnn_out, z)
        dec_w1=xavier(ks[3], R + L, H),
        dec_b1=0.01 * jnp.ones((1, H), jnp.float32),
        dec_w2=xavier(ks[4], H, V),
        dec_b2=jnp.zeros((1, V), jnp.float32),
        # GRU (gate order r, z, n), pre-transposed to (in, out)
        gru_wih=0.1 * jax.random.normal(ks[5], (3, E, R), jnp.float32),
        gru_whh=0.1 * jax.random.normal(ks[6], (3, R, R), jnp.float32),
        gru_bih=0.1 * jax.random.normal(ks[7], (3, 1, R), jnp.float32),
        gru_bhh=0.1 * jax.random.normal(ks[8], (3, 1, R), jnp.float32),
    )
    fused_params = prepare_params(raw_params)   # one-time, outside jit

    x = jax.random.randint(ks[9], (B, S), 0, V + 1, dtype=jnp.int32)
    x_lens = jnp.array([S, S - 2], dtype=jnp.int32)   # sorted desc, max == S
    # TODO(synk): reference draws np.random noise inside forward; here the
    # reparameterization noise is a deterministic explicit input.
    eps = jax.random.normal(ks[10], (B, L), jnp.float32)

    fwd = jax.jit(model_pe_forward)
    dec_out, z_mu, z_log_sigma = fwd(fused_params, x, x_lens, eps)
    jax.block_until_ready((dec_out, z_mu, z_log_sigma))

    assert dec_out.shape == (B, S, V)
    assert z_mu.shape == (B * S, L)
    assert z_log_sigma.shape == (B * S, L)
    assert bool(jnp.all(jnp.isfinite(dec_out)))
    assert bool(jnp.all(jnp.isfinite(z_mu)))
    assert bool(jnp.all(jnp.isfinite(z_log_sigma)))
    print("KERNEL_OK")
</pallas_src>

<mosaic_0001>
module attributes {stable_mosaic.version = 11 : i64} {
  func.func @fused_svae_kernel(%arg0: i32, %arg1: i32, %arg2: memref<2x8x32xbf16, #tpu.memory_space<vmem>>, %arg3: memref<2x1xi32, #tpu.memory_space<vmem>>, %arg4: memref<2x16xf32, #tpu.memory_space<vmem>>, %arg5: memref<32x32xbf16, #tpu.memory_space<vmem>>, %arg6: memref<1x32xf32, #tpu.memory_space<vmem>>, %arg7: memref<32x16xbf16, #tpu.memory_space<vmem>>, %arg8: memref<1x16xf32, #tpu.memory_space<vmem>>, %arg9: memref<32x16xbf16, #tpu.memory_space<vmem>>, %arg10: memref<1x16xf32, #tpu.memory_space<vmem>>, %arg11: memref<32x32xbf16, #tpu.memory_space<vmem>>, %arg12: memref<32x32xbf16, #tpu.memory_space<vmem>>, %arg13: memref<32x32xbf16, #tpu.memory_space<vmem>>, %arg14: memref<32x32xbf16, #tpu.memory_space<vmem>>, %arg15: memref<32x32xbf16, #tpu.memory_space<vmem>>, %arg16: memref<32x32xbf16, #tpu.memory_space<vmem>>, %arg17: memref<1x32xf32, #tpu.memory_space<vmem>>, %arg18: memref<1x32xf32, #tpu.memory_space<vmem>>, %arg19: memref<1x32xf32, #tpu.memory_space<vmem>>, %arg20: memref<1x32xf32, #tpu.memory_space<vmem>>, %arg21: memref<32x32xbf16, #tpu.memory_space<vmem>>, %arg22: memref<16x32xbf16, #tpu.memory_space<vmem>>, %arg23: memref<1x32xf32, #tpu.memory_space<vmem>>, %arg24: memref<32x128xbf16, #tpu.memory_space<vmem>>, %arg25: memref<1x128xf32, #tpu.memory_space<vmem>>, %arg26: memref<16x128xf32, #tpu.memory_space<vmem>>, %arg27: memref<2x16xf32, #tpu.memory_space<vmem>>, %arg28: memref<2x16xf32, #tpu.memory_space<vmem>>, %arg29: memref<16x32xbf16, #tpu.memory_space<vmem>>) attributes {dimension_semantics = [#tpu.dimension_semantics<parallel>, #tpu.dimension_semantics<arbitrary>], iteration_bounds = array<i64: 1, 1>, scalar_prefetch = 0 : i64, scratch_operands = 1 : i64, tpu.core_type = #tpu.core_type<tc>, window_params = [{transform_indices = @transform_0, window_bounds = array<i64: 2, 8, 32>}, {transform_indices = @transform_1, window_bounds = array<i64: 2, 1>}, {transform_indices = @transform_2, window_bounds = array<i64: 2, 16>}, {pipeline_mode = #tpu.pipeline_mode<synchronous>, transform_indices = @transform_3, window_bounds = array<i64: 32, 32>}, {pipeline_mode = #tpu.pipeline_mode<synchronous>, transform_indices = @transform_4, window_bounds = array<i64: 1, 32>}, {pipeline_mode = #tpu.pipeline_mode<synchronous>, transform_indices = @transform_5, window_bounds = array<i64: 32, 16>}, {pipeline_mode = #tpu.pipeline_mode<synchronous>, transform_indices = @transform_6, window_bounds = array<i64: 1, 16>}, {pipeline_mode = #tpu.pipeline_mode<synchronous>, transform_indices = @transform_7, window_bounds = array<i64: 32, 16>}, {pipeline_mode = #tpu.pipeline_mode<synchronous>, transform_indices = @transform_8, window_bounds = array<i64: 1, 16>}, {pipeline_mode = #tpu.pipeline_mode<synchronous>, transform_indices = @transform_9, window_bounds = array<i64: 32, 32>}, {pipeline_mode = #tpu.pipeline_mode<synchronous>, transform_indices = @transform_10, window_bounds = array<i64: 32, 32>}, {pipeline_mode = #tpu.pipeline_mode<synchronous>, transform_indices = @transform_11, window_bounds = array<i64: 32, 32>}, {pipeline_mode = #tpu.pipeline_mode<synchronous>, transform_indices = @transform_12, window_bounds = array<i64: 32, 32>}, {pipeline_mode = #tpu.pipeline_mode<synchronous>, transform_indices = @transform_13, window_bounds = array<i64: 32, 32>}, {pipeline_mode = #tpu.pipeline_mode<synchronous>, transform_indices = @transform_14, window_bounds = array<i64: 32, 32>}, {pipeline_mode = #tpu.pipeline_mode<synchronous>, transform_indices = @transform_15, window_bounds = array<i64: 1, 32>}, {pipeline_mode = #tpu.pipeline_mode<synchronous>, transform_indices = @transform_16, window_bounds = array<i64: 1, 32>}, {pipeline_mode = #tpu.pipeline_mode<synchronous>, transform_indices = @transform_17, window_bounds = array<i64: 1, 32>}, {pipeline_mode = #tpu.pipeline_mode<synchronous>, transform_indices = @transform_18, window_bounds = array<i64: 1, 32>}, {pipeline_mode = #tpu.pipeline_mode<synchronous>, transform_indices = @transform_19, window_bounds = array<i64: 32, 32>}, {pipeline_mode = #tpu.pipeline_mode<synchronous>, transform_indices = @transform_20, window_bounds = array<i64: 16, 32>}, {pipeline_mode = #tpu.pipeline_mode<synchronous>, transform_indices = @transform_21, window_bounds = array<i64: 1, 32>}, {transform_indices = @transform_22, window_bounds = array<i64: 32, 128>}, {transform_indices = @transform_23, window_bounds = array<i64: 1, 128>}, {transform_indices = @transform_24, window_bounds = array<i64: 16, 128>}, {transform_indices = @transform_25, window_bounds = array<i64: 2, 16>}, {transform_indices = @transform_26, window_bounds = array<i64: 2, 16>}]} {
    %c0_i32 = arith.constant 0 : i32
    %0 = arith.cmpi eq, %arg1, %c0_i32 : i32
    %1 = arith.extui %0 : i1 to i32
    %c0_i32_0 = arith.constant 0 : i32
    %2 = arith.cmpi ne, %1, %c0_i32_0 : i32
    scf.if %2 {
      %c0_8 = arith.constant 0 : index
      %c0_9 = arith.constant 0 : index
      %c0_10 = arith.constant 0 : index
      %10 = vector.load %arg2[%c0_8, %c0_9, %c0_10] : memref<2x8x32xbf16, #tpu.memory_space<vmem>>, vector<2x8x32xbf16>
      %11 = vector.extract_strided_slice %10 {offsets = [0, 0, 0], sizes = [2, 7, 32], strides = [1, 1, 1]} : vector<2x8x32xbf16> to vector<2x7x32xbf16>
      %12 = arith.extf %11 : vector<2x7x32xbf16> to vector<2x7x32xf32>
      %cst_11 = arith.constant dense<0.000000e+00> : vector<2x32xf32>
      %13 = vector.multi_reduction <add>, %12, %cst_11 [1] : vector<2x7x32xf32> to vector<2x32xf32>
      %14 = arith.truncf %13 : vector<2x32xf32> to vector<2x32xbf16>
      %c0_12 = arith.constant 0 : index
      %c0_13 = arith.constant 0 : index
      %15 = vector.load %arg5[%c0_12, %c0_13] : memref<32x32xbf16, #tpu.memory_space<vmem>>, vector<32x32xbf16>
      %cst_14 = arith.constant dense<0.000000e+00> : vector<2x32xf32>
      %16 = tpu.matmul %14, %15, %cst_14 {dimension_numbers = #tpu.dot_dimension_numbers<[1], [0], [0], [1], [0, 0, 1, 1], [], []>} : vector<2x32xbf16>, vector<32x32xbf16>, vector<2x32xf32> -> vector<2x32xf32>
      %c0_15 = arith.constant 0 : index
      %c0_16 = arith.constant 0 : index
      %17 = vector.load %arg6[%c0_15, %c0_16] : memref<1x32xf32, #tpu.memory_space<vmem>>, vector<1x32xf32>
      %18 = vector.broadcast %17 : vector<1x32xf32> to vector<2x32xf32>
      %19 = arith.addf %16, %18 : vector<2x32xf32>
      %20 = math.tanh %19 : vector<2x32xf32>
      %21 = arith.truncf %20 : vector<2x32xf32> to vector<2x32xbf16>
      %c0_17 = arith.constant 0 : index
      %c0_18 = arith.constant 0 : index
      %22 = vector.load %arg7[%c0_17, %c0_18] : memref<32x16xbf16, #tpu.memory_space<vmem>>, vector<32x16xbf16>
      %cst_19 = arith.constant dense<0.000000e+00> : vector<2x16xf32>
      %23 = tpu.matmul %21, %22, %cst_19 {dimension_numbers = #tpu.dot_dimension_numbers<[1], [0], [0], [1], [0, 0, 1, 1], [], []>} : vector<2x32xbf16>, vector<32x16xbf16>, vector<2x16xf32> -> vector<2x16xf32>
      %c0_20 = arith.constant 0 : index
      %c0_21 = arith.constant 0 : index
      %24 = vector.load %arg8[%c0_20, %c0_21] : memref<1x16xf32, #tpu.memory_space<vmem>>, vector<1x16xf32>
      %25 = vector.broadcast %24 : vector<1x16xf32> to vector<2x16xf32>
      %26 = arith.addf %23, %25 : vector<2x16xf32>
      %c0_22 = arith.constant 0 : index
      %c0_23 = arith.constant 0 : index
      %27 = vector.load %arg9[%c0_22, %c0_23] : memref<32x16xbf16, #tpu.memory_space<vmem>>, vector<32x16xbf16>
      %cst_24 = arith.constant dense<0.000000e+00> : vector<2x16xf32>
      %28 = tpu.matmul %21, %27, %cst_24 {dimension_numbers = #tpu.dot_dimension_numbers<[1], [0], [0], [1], [0, 0, 1, 1], [], []>} : vector<2x32xbf16>, vector<32x16xbf16>, vector<2x16xf32> -> vector<2x16xf32>
      %c0_25 = arith.constant 0 : index
      %c0_26 = arith.constant 0 : index
      %29 = vector.load %arg10[%c0_25, %c0_26] : memref<1x16xf32, #tpu.memory_space<vmem>>, vector<1x16xf32>
      %30 = vector.broadcast %29 : vector<1x16xf32> to vector<2x16xf32>
      %31 = arith.addf %28, %30 : vector<2x16xf32>
      %c0_27 = arith.constant 0 : index
      %c0_28 = arith.constant 0 : index
      %32 = vector.load %arg27[%c0_27, %c0_28] : memref<2x16xf32, #tpu.memory_space<vmem>>, vector<2x16xf32>
      tpu.vector_store %arg27[%c0_27, %c0_28], %26 {strides = array<i32>} : memref<2x16xf32, #tpu.memory_space<vmem>>, vector<2x16xf32>,
      %c0_29 = arith.constant 0 : index
      %c0_30 = arith.constant 0 : index
      %33 = vector.load %arg28[%c0_29, %c0_30] : memref<2x16xf32, #tpu.memory_space<vmem>>, vector<2x16xf32>
      tpu.vector_store %arg28[%c0_29, %c0_30], %31 {strides = array<i32>} : memref<2x16xf32, #tpu.memory_space<vmem>>, vector<2x16xf32>,
      %34 = math.exp %31 : vector<2x16xf32>
      %c0_31 = arith.constant 0 : index
      %c0_32 = arith.constant 0 : index
      %35 = vector.load %arg4[%c0_31, %c0_32] : memref<2x16xf32, #tpu.memory_space<vmem>>, vector<2x16xf32>
      %36 = arith.mulf %34, %35 : vector<2x16xf32>
      %37 = arith.addf %26, %36 : vector<2x16xf32>
      %38 = vector.shape_cast %10 : vector<2x8x32xbf16> to vector<16x32xbf16>
      %c0_33 = arith.constant 0 : index
      %c0_34 = arith.constant 0 : index
      %39 = vector.load %arg11[%c0_33, %c0_34] : memref<32x32xbf16, #tpu.memory_space<vmem>>, vector<32x32xbf16>
      %cst_35 = arith.constant dense<0.000000e+00> : vector<16x32xf32>
      %40 = tpu.matmul %38, %39, %cst_35 {dimension_numbers = #tpu.dot_dimension_numbers<[1], [0], [0], [1], [0, 0, 1, 1], [], []>} : vector<16x32xbf16>, vector<32x32xbf16>, vector<16x32xf32> -> vector<16x32xf32>
      %c0_36 = arith.constant 0 : index
      %c0_37 = arith.constant 0 : index
      %41 = vector.load %arg17[%c0_36, %c0_37] : memref<1x32xf32, #tpu.memory_space<vmem>>, vector<1x32xf32>
      %42 = vector.broadcast %41 : vector<1x32xf32> to vector<16x32xf32>
      %43 = arith.addf %40, %42 : vector<16x32xf32>
      %44 = vector.shape_cast %43 : vector<16x32xf32> to vector<2x8x32xf32>
      %c0_38 = arith.constant 0 : index
      %c0_39 = arith.constant 0 : index
      %45 = vector.load %arg12[%c0_38, %c0_39] : memref<32x32xbf16, #tpu.memory_space<vmem>>, vector<32x32xbf16>
      %cst_40 = arith.constant dense<0.000000e+00> : vector<16x32xf32>
      %46 = tpu.matmul %38, %45, %cst_40 {dimension_numbers = #tpu.dot_dimension_numbers<[1], [0], [0], [1], [0, 0, 1, 1], [], []>} : vector<16x32xbf16>, vector<32x32xbf16>, vector<16x32xf32> -> vector<16x32xf32>
      %c0_41 = arith.constant 0 : index
      %c0_42 = arith.constant 0 : index
      %47 = vector.load %arg18[%c0_41, %c0_42] : memref<1x32xf32, #tpu.memory_space<vmem>>, vector<1x32xf32>
      %48 = vector.broadcast %47 : vector<1x32xf32> to vector<16x32xf32>
      %49 = arith.addf %46, %48 : vector<16x32xf32>
      %50 = vector.shape_cast %49 : vector<16x32xf32> to vector<2x8x32xf32>
      %c0_43 = arith.constant 0 : index
      %c0_44 = arith.constant 0 : index
      %51 = vector.load %arg13[%c0_43, %c0_44] : memref<32x32xbf16, #tpu.memory_space<vmem>>, vector<32x32xbf16>
      %cst_45 = arith.constant dense<0.000000e+00> : vector<16x32xf32>
      %52 = tpu.matmul %38, %51, %cst_45 {dimension_numbers = #tpu.dot_dimension_numbers<[1], [0], [0], [1], [0, 0, 1, 1], [], []>} : vector<16x32xbf16>, vector<32x32xbf16>, vector<16x32xf32> -> vector<16x32xf32>
      %c0_46 = arith.constant 0 : index
      %c0_47 = arith.constant 0 : index
      %53 = vector.load %arg19[%c0_46, %c0_47] : memref<1x32xf32, #tpu.memory_space<vmem>>, vector<1x32xf32>
      %54 = vector.broadcast %53 : vector<1x32xf32> to vector<16x32xf32>
      %55 = arith.addf %52, %54 : vector<16x32xf32>
      %56 = vector.shape_cast %55 : vector<16x32xf32> to vector<2x8x32xf32>
      %c0_48 = arith.constant 0 : index
      %c0_49 = arith.constant 0 : index
      %57 = vector.load %arg14[%c0_48, %c0_49] : memref<32x32xbf16, #tpu.memory_space<vmem>>, vector<32x32xbf16>
      %c0_50 = arith.constant 0 : index
      %c0_51 = arith.constant 0 : index
      %58 = vector.load %arg15[%c0_50, %c0_51] : memref<32x32xbf16, #tpu.memory_space<vmem>>, vector<32x32xbf16>
      %c0_52 = arith.constant 0 : index
      %c0_53 = arith.constant 0 : index
      %59 = vector.load %arg16[%c0_52, %c0_53] : memref<32x32xbf16, #tpu.memory_space<vmem>>, vector<32x32xbf16>
      %c0_54 = arith.constant 0 : index
      %c0_55 = arith.constant 0 : index
      %60 = vector.load %arg20[%c0_54, %c0_55] : memref<1x32xf32, #tpu.memory_space<vmem>>, vector<1x32xf32>
      %61 = tpu.iota {dimensions = array<i32: 1>} : vector<2x8xi32>
      %c0_56 = arith.constant 0 : index
      %c0_57 = arith.constant 0 : index
      %62 = vector.load %arg3[%c0_56, %c0_57] : memref<2x1xi32, #tpu.memory_space<vmem>>, vector<2x1xi32>
      %63 = vector.broadcast %62 : vector<2x1xi32> to vector<2x8xi32>
      %64 = arith.cmpi sgt, %63, %61 : vector<2x8xi32>
      %cst_58 = arith.constant 0.000000e+00 : f32
      %65 = vector.broadcast %cst_58 : f32 to vector<2x32xf32>
      %66 = arith.truncf %65 : vector<2x32xf32> to vector<2x32xbf16>
      %cst_59 = arith.constant dense<0.000000e+00> : vector<2x32xf32>
      %67 = tpu.matmul %66, %57, %cst_59 {dimension_numbers = #tpu.dot_dimension_numbers<[1], [0], [0], [1], [0, 0, 1, 1], [], []>} : vector<2x32xbf16>, vector<32x32xbf16>, vector<2x32xf32> -> vector<2x32xf32>
      %cst_60 = arith.constant dense<0.000000e+00> : vector<2x32xf32>
      %68 = tpu.matmul %66, %58, %cst_60 {dimension_numbers = #tpu.dot_dimension_numbers<[1], [0], [0], [1], [0, 0, 1, 1], [], []>} : vector<2x32xbf16>, vector<32x32xbf16>, vector<2x32xf32> -> vector<2x32xf32>
      %cst_61 = arith.constant dense<0.000000e+00> : vector<2x32xf32>
      %69 = tpu.matmul %66, %59, %cst_61 {dimension_numbers = #tpu.dot_dimension_numbers<[1], [0], [0], [1], [0, 0, 1, 1], [], []>} : vector<2x32xbf16>, vector<32x32xbf16>, vector<2x32xf32> -> vector<2x32xf32>
      %70 = vector.extract_strided_slice %44 {offsets = [0, 0, 0], sizes = [2, 1, 32], strides = [1, 1, 1]} : vector<2x8x32xf32> to vector<2x1x32xf32>
      %71 = vector.shape_cast %70 : vector<2x1x32xf32> to vector<2x32xf32>
      %72 = arith.addf %71, %67 : vector<2x32xf32>
      %73 = arith.negf %72 : vector<2x32xf32>
      %74 = math.exp %73 : vector<2x32xf32>
      %cst_62 = arith.constant 1.000000e+00 : f32
      %75 = vector.broadcast %cst_62 : f32 to vector<2x32xf32>
      %76 = arith.addf %75, %74 : vector<2x32xf32>
      %77 = arith.divf %75, %76 : vector<2x32xf32>
      %78 = vector.extract_strided_slice %50 {offsets = [0, 0, 0], sizes = [2, 1, 32], strides = [1, 1, 1]} : vector<2x8x32xf32> to vector<2x1x32xf32>
      %79 = vector.shape_cast %78 : vector<2x1x32xf32> to vector<2x32xf32>
      %80 = arith.addf %79, %68 : vector<2x32xf32>
      %81 = arith.negf %80 : vector<2x32xf32>
      %82 = math.exp %81 : vector<2x32xf32>
      %cst_63 = arith.constant 1.000000e+00 : f32
      %83 = vector.broadcast %cst_63 : f32 to vector<2x32xf32>
      %84 = arith.addf %83, %82 : vector<2x32xf32>
      %85 = arith.divf %83, %84 : vector<2x32xf32>
      %86 = vector.extract_strided_slice %56 {offsets = [0, 0, 0], sizes = [2, 1, 32], strides = [1, 1, 1]} : vector<2x8x32xf32> to vector<2x1x32xf32>
      %87 = vector.shape_cast %86 : vector<2x1x32xf32> to vector<2x32xf32>
      %88 = vector.broadcast %60 : vector<1x32xf32> to vector<2x32xf32>
      %89 = arith.addf %69, %88 : vector<2x32xf32>
      %90 = arith.mulf %77, %89 : vector<2x32xf32>
      %91 = arith.addf %87, %90 : vector<2x32xf32>
      %92 = math.tanh %91 : vector<2x32xf32>
      %cst_64 = arith.constant 1.000000e+00 : f32
      %93 = vector.broadcast %cst_64 : f32 to vector<2x32xf32>
      %94 = arith.subf %93, %85 : vector<2x32xf32>
      %95 = arith.mulf %94, %92 : vector<2x32xf32>
      %96 = arith.mulf %85, %65 : vector<2x32xf32>
      %97 = arith.addf %95, %96 : vector<2x32xf32>
      %98 = vector.extract_strided_slice %64 {offsets = [0, 0], sizes = [2, 1], strides = [1, 1]} : vector<2x8xi1> to vector<2x1xi1>
      %99 = vector.shape_cast %98 : vector<2x1xi1> to vector<2x1xi1>
      %100 = vector.broadcast %99 : vector<2x1xi1> to vector<2x32xi1>
      %101 = arith.select %100, %97, %65 : vector<2x32xi1>, vector<2x32xf32>
      %cst_65 = arith.constant 0.000000e+00 : f32
      %102 = vector.shape_cast %98 : vector<2x1xi1> to vector<2x1xi1>
      %103 = vector.broadcast %102 : vector<2x1xi1> to vector<2x32xi1>
      %104 = vector.broadcast %cst_65 : f32 to vector<2x32xf32>
      %105 = arith.select %103, %97, %104 : vector<2x32xi1>, vector<2x32xf32>
      %106 = arith.truncf %101 : vector<2x32xf32> to vector<2x32xbf16>
      %cst_66 = arith.constant dense<0.000000e+00> : vector<2x32xf32>
      %107 = tpu.matmul %106, %57, %cst_66 {dimension_numbers = #tpu.dot_dimension_numbers<[1], [0], [0], [1], [0, 0, 1, 1], [], []>} : vector<2x32xbf16>, vector<32x32xbf16>, vector<2x32xf32> -> vector<2x32xf32>
      %cst_67 = arith.constant dense<0.000000e+00> : vector<2x32xf32>
      %108 = tpu.matmul %106, %58, %cst_67 {dimension_numbers = #tpu.dot_dimension_numbers<[1], [0], [0], [1], [0, 0, 1, 1], [], []>} : vector<2x32xbf16>, vector<32x32xbf16>, vector<2x32xf32> -> vector<2x32xf32>
      %cst_68 = arith.constant dense<0.000000e+00> : vector<2x32xf32>
      %109 = tpu.matmul %106, %59, %cst_68 {dimension_numbers = #tpu.dot_dimension_numbers<[1], [0], [0], [1], [0, 0, 1, 1], [], []>} : vector<2x32xbf16>, vector<32x32xbf16>, vector<2x32xf32> -> vector<2x32xf32>
      %110 = vector.extract_strided_slice %44 {offsets = [0, 1, 0], sizes = [2, 1, 32], strides = [1, 1, 1]} : vector<2x8x32xf32> to vector<2x1x32xf32>
      %111 = vector.shape_cast %110 : vector<2x1x32xf32> to vector<2x32xf32>
      %112 = arith.addf %111, %107 : vector<2x32xf32>
      %113 = arith.negf %112 : vector<2x32xf32>
      %114 = math.exp %113 : vector<2x32xf32>
      %cst_69 = arith.constant 1.000000e+00 : f32
      %115 = vector.broadcast %cst_69 : f32 to vector<2x32xf32>
      %116 = arith.addf %115, %114 : vector<2x32xf32>
      %117 = arith.divf %115, %116 : vector<2x32xf32>
      %118 = vector.extract_strided_slice %50 {offsets = [0, 1, 0], sizes = [2, 1, 32], strides = [1, 1, 1]} : vector<2x8x32xf32> to vector<2x1x32xf32>
      %119 = vector.shape_cast %118 : vector<2x1x32xf32> to vector<2x32xf32>
      %120 = arith.addf %119, %108 : vector<2x32xf32>
      %121 = arith.negf %120 : vector<2x32xf32>
      %122 = math.exp %121 : vector<2x32xf32>
      %cst_70 = arith.constant 1.000000e+00 : f32
      %123 = vector.broadcast %cst_70 : f32 to vector<2x32xf32>
      %124 = arith.addf %123, %122 : vector<2x32xf32>
      %125 = arith.divf %123, %124 : vector<2x32xf32>
      %126 = vector.extract_strided_slice %56 {offsets = [0, 1, 0], sizes = [2, 1, 32], strides = [1, 1, 1]} : vector<2x8x32xf32> to vector<2x1x32xf32>
      %127 = vector.shape_cast %126 : vector<2x1x32xf32> to vector<2x32xf32>
      %128 = vector.broadcast %60 : vector<1x32xf32> to vector<2x32xf32>
      %129 = arith.addf %109, %128 : vector<2x32xf32>
      %130 = arith.mulf %117, %129 : vector<2x32xf32>
      %131 = arith.addf %127, %130 : vector<2x32xf32>
      %132 = math.tanh %131 : vector<2x32xf32>
      %cst_71 = arith.constant 1.000000e+00 : f32
      %133 = vector.broadcast %cst_71 : f32 to vector<2x32xf32>
      %134 = arith.subf %133, %125 : vector<2x32xf32>
      %135 = arith.mulf %134, %132 : vector<2x32xf32>
      %136 = arith.mulf %125, %101 : vector<2x32xf32>
      %137 = arith.addf %135, %136 : vector<2x32xf32>
      %138 = vector.extract_strided_slice %64 {offsets = [0, 1], sizes = [2, 1], strides = [1, 1]} : vector<2x8xi1> to vector<2x1xi1>
      %139 = vector.shape_cast %138 : vector<2x1xi1> to vector<2x1xi1>
      %140 = vector.broadcast %139 : vector<2x1xi1> to vector<2x32xi1>
      %141 = arith.select %140, %137, %101 : vector<2x32xi1>, vector<2x32xf32>
      %cst_72 = arith.constant 0.000000e+00 : f32
      %142 = vector.shape_cast %138 : vector<2x1xi1> to vector<2x1xi1>
      %143 = vector.broadcast %142 : vector<2x1xi1> to vector<2x32xi1>
      %144 = vector.broadcast %cst_72 : f32 to vector<2x32xf32>
      %145 = arith.select %143, %137, %144 : vector<2x32xi1>, vector<2x32xf32>
      %146 = arith.truncf %141 : vector<2x32xf32> to vector<2x32xbf16>
      %cst_73 = arith.constant dense<0.000000e+00> : vector<2x32xf32>
      %147 = tpu.matmul %146, %57, %cst_73 {dimension_numbers = #tpu.dot_dimension_numbers<[1], [0], [0], [1], [0, 0, 1, 1], [], []>} : vector<2x32xbf16>, vector<32x32xbf16>, vector<2x32xf32> -> vector<2x32xf32>
      %cst_74 = arith.constant dense<0.000000e+00> : vector<2x32xf32>
      %148 = tpu.matmul %146, %58, %cst_74 {dimension_numbers = #tpu.dot_dimension_numbers<[1], [0], [0], [1], [0, 0, 1, 1], [], []>} : vector<2x32xbf16>, vector<32x32xbf16>, vector<2x32xf32> -> vector<2x32xf32>
      %cst_75 = arith.constant dense<0.000000e+00> : vector<2x32xf32>
      %149 = tpu.matmul %146, %59, %cst_75 {dimension_numbers = #tpu.dot_dimension_numbers<[1], [0], [0], [1], [0, 0, 1, 1], [], []>} : vector<2x32xbf16>, vector<32x32xbf16>, vector<2x32xf32> -> vector<2x32xf32>
      %150 = vector.extract_strided_slice %44 {offsets = [0, 2, 0], sizes = [2, 1, 32], strides = [1, 1, 1]} : vector<2x8x32xf32> to vector<2x1x32xf32>
      %151 = vector.shape_cast %150 : vector<2x1x32xf32> to vector<2x32xf32>
      %152 = arith.addf %151, %147 : vector<2x32xf32>
      %153 = arith.negf %152 : vector<2x32xf32>
      %154 = math.exp %153 : vector<2x32xf32>
      %cst_76 = arith.constant 1.000000e+00 : f32
      %155 = vector.broadcast %cst_76 : f32 to vector<2x32xf32>
      %156 = arith.addf %155, %154 : vector<2x32xf32>
      %157 = arith.divf %155, %156 : vector<2x32xf32>
      %158 = vector.extract_strided_slice %50 {offsets = [0, 2, 0], sizes = [2, 1, 32], strides = [1, 1, 1]} : vector<2x8x32xf32> to vector<2x1x32xf32>
      %159 = vector.shape_cast %158 : vector<2x1x32xf32> to vector<2x32xf32>
      %160 = arith.addf %159, %148 : vector<2x32xf32>
      %161 = arith.negf %160 : vector<2x32xf32>
      %162 = math.exp %161 : vector<2x32xf32>
      %cst_77 = arith.constant 1.000000e+00 : f32
      %163 = vector.broadcast %cst_77 : f32 to vector<2x32xf32>
      %164 = arith.addf %163, %162 : vector<2x32xf32>
      %165 = arith.divf %163, %164 : vector<2x32xf32>
      %166 = vector.extract_strided_slice %56 {offsets = [0, 2, 0], sizes = [2, 1, 32], strides = [1, 1, 1]} : vector<2x8x32xf32> to vector<2x1x32xf32>
      %167 = vector.shape_cast %166 : vector<2x1x32xf32> to vector<2x32xf32>
      %168 = vector.broadcast %60 : vector<1x32xf32> to vector<2x32xf32>
      %169 = arith.addf %149, %168 : vector<2x32xf32>
      %170 = arith.mulf %157, %169 : vector<2x32xf32>
      %171 = arith.addf %167, %170 : vector<2x32xf32>
      %172 = math.tanh %171 : vector<2x32xf32>
      %cst_78 = arith.constant 1.000000e+00 : f32
      %173 = vector.broadcast %cst_78 : f32 to vector<2x32xf32>
      %174 = arith.subf %173, %165 : vector<2x32xf32>
      %175 = arith.mulf %174, %172 : vector<2x32xf32>
      %176 = arith.mulf %165, %141 : vector<2x32xf32>
      %177 = arith.addf %175, %176 : vector<2x32xf32>
      %178 = vector.extract_strided_slice %64 {offsets = [0, 2], sizes = [2, 1], strides = [1, 1]} : vector<2x8xi1> to vector<2x1xi1>
      %179 = vector.shape_cast %178 : vector<2x1xi1> to vector<2x1xi1>
      %180 = vector.broadcast %179 : vector<2x1xi1> to vector<2x32xi1>
      %181 = arith.select %180, %177, %141 : vector<2x32xi1>, vector<2x32xf32>
      %cst_79 = arith.constant 0.000000e+00 : f32
      %182 = vector.shape_cast %178 : vector<2x1xi1> to vector<2x1xi1>
      %183 = vector.broadcast %182 : vector<2x1xi1> to vector<2x32xi1>
      %184 = vector.broadcast %cst_79 : f32 to vector<2x32xf32>
      %185 = arith.select %183, %177, %184 : vector<2x32xi1>, vector<2x32xf32>
      %186 = arith.truncf %181 : vector<2x32xf32> to vector<2x32xbf16>
      %cst_80 = arith.constant dense<0.000000e+00> : vector<2x32xf32>
      %187 = tpu.matmul %186, %57, %cst_80 {dimension_numbers = #tpu.dot_dimension_numbers<[1], [0], [0], [1], [0, 0, 1, 1], [], []>} : vector<2x32xbf16>, vector<32x32xbf16>, vector<2x32xf32> -> vector<2x32xf32>
      %cst_81 = arith.constant dense<0.000000e+00> : vector<2x32xf32>
      %188 = tpu.matmul %186, %58, %cst_81 {dimension_numbers = #tpu.dot_dimension_numbers<[1], [0], [0], [1], [0, 0, 1, 1], [], []>} : vector<2x32xbf16>, vector<32x32xbf16>, vector<2x32xf32> -> vector<2x32xf32>
      %cst_82 = arith.constant dense<0.000000e+00> : vector<2x32xf32>
      %189 = tpu.matmul %186, %59, %cst_82 {dimension_numbers = #tpu.dot_dimension_numbers<[1], [0], [0], [1], [0, 0, 1, 1], [], []>} : vector<2x32xbf16>, vector<32x32xbf16>, vector<2x32xf32> -> vector<2x32xf32>
      %190 = vector.extract_strided_slice %44 {offsets = [0, 3, 0], sizes = [2, 1, 32], strides = [1, 1, 1]} : vector<2x8x32xf32> to vector<2x1x32xf32>
      %191 = vector.shape_cast %190 : vector<2x1x32xf32> to vector<2x32xf32>
      %192 = arith.addf %191, %187 : vector<2x32xf32>
      %193 = arith.negf %192 : vector<2x32xf32>
      %194 = math.exp %193 : vector<2x32xf32>
      %cst_83 = arith.constant 1.000000e+00 : f32
      %195 = vector.broadcast %cst_83 : f32 to vector<2x32xf32>
      %196 = arith.addf %195, %194 : vector<2x32xf32>
      %197 = arith.divf %195, %196 : vector<2x32xf32>
      %198 = vector.extract_strided_slice %50 {offsets = [0, 3, 0], sizes = [2, 1, 32], strides = [1, 1, 1]} : vector<2x8x32xf32> to vector<2x1x32xf32>
      %199 = vector.shape_cast %198 : vector<2x1x32xf32> to vector<2x32xf32>
      %200 = arith.addf %199, %188 : vector<2x32xf32>
      %201 = arith.negf %200 : vector<2x32xf32>
      %202 = math.exp %201 : vector<2x32xf32>
      %cst_84 = arith.constant 1.000000e+00 : f32
      %203 = vector.broadcast %cst_84 : f32 to vector<2x32xf32>
      %204 = arith.addf %203, %202 : vector<2x32xf32>
      %205 = arith.divf %203, %204 : vector<2x32xf32>
      %206 = vector.extract_strided_slice %56 {offsets = [0, 3, 0], sizes = [2, 1, 32], strides = [1, 1, 1]} : vector<2x8x32xf32> to vector<2x1x32xf32>
      %207 = vector.shape_cast %206 : vector<2x1x32xf32> to vector<2x32xf32>
      %208 = vector.broadcast %60 : vector<1x32xf32> to vector<2x32xf32>
      %209 = arith.addf %189, %208 : vector<2x32xf32>
      %210 = arith.mulf %197, %209 : vector<2x32xf32>
      %211 = arith.addf %207, %210 : vector<2x32xf32>
      %212 = math.tanh %211 : vector<2x32xf32>
      %cst_85 = arith.constant 1.000000e+00 : f32
      %213 = vector.broadcast %cst_85 : f32 to vector<2x32xf32>
      %214 = arith.subf %213, %205 : vector<2x32xf32>
      %215 = arith.mulf %214, %212 : vector<2x32xf32>
      %216 = arith.mulf %205, %181 : vector<2x32xf32>
      %217 = arith.addf %215, %216 : vector<2x32xf32>
      %218 = vector.extract_strided_slice %64 {offsets = [0, 3], sizes = [2, 1], strides = [1, 1]} : vector<2x8xi1> to vector<2x1xi1>
      %219 = vector.shape_cast %218 : vector<2x1xi1> to vector<2x1xi1>
      %220 = vector.broadcast %219 : vector<2x1xi1> to vector<2x32xi1>
      %221 = arith.select %220, %217, %181 : vector<2x32xi1>, vector<2x32xf32>
      %cst_86 = arith.constant 0.000000e+00 : f32
      %222 = vector.shape_cast %218 : vector<2x1xi1> to vector<2x1xi1>
      %223 = vector.broadcast %222 : vector<2x1xi1> to vector<2x32xi1>
      %224 = vector.broadcast %cst_86 : f32 to vector<2x32xf32>
      %225 = arith.select %223, %217, %224 : vector<2x32xi1>, vector<2x32xf32>
      %226 = arith.truncf %221 : vector<2x32xf32> to vector<2x32xbf16>
      %cst_87 = arith.constant dense<0.000000e+00> : vector<2x32xf32>
      %227 = tpu.matmul %226, %57, %cst_87 {dimension_numbers = #tpu.dot_dimension_numbers<[1], [0], [0], [1], [0, 0, 1, 1], [], []>} : vector<2x32xbf16>, vector<32x32xbf16>, vector<2x32xf32> -> vector<2x32xf32>
      %cst_88 = arith.constant dense<0.000000e+00> : vector<2x32xf32>
      %228 = tpu.matmul %226, %58, %cst_88 {dimension_numbers = #tpu.dot_dimension_numbers<[1], [0], [0], [1], [0, 0, 1, 1], [], []>} : vector<2x32xbf16>, vector<32x32xbf16>, vector<2x32xf32> -> vector<2x32xf32>
      %cst_89 = arith.constant dense<0.000000e+00> : vector<2x32xf32>
      %229 = tpu.matmul %226, %59, %cst_89 {dimension_numbers = #tpu.dot_dimension_numbers<[1], [0], [0], [1], [0, 0, 1, 1], [], []>} : vector<2x32xbf16>, vector<32x32xbf16>, vector<2x32xf32> -> vector<2x32xf32>
      %230 = vector.extract_strided_slice %44 {offsets = [0, 4, 0], sizes = [2, 1, 32], strides = [1, 1, 1]} : vector<2x8x32xf32> to vector<2x1x32xf32>
      %231 = vector.shape_cast %230 : vector<2x1x32xf32> to vector<2x32xf32>
      %232 = arith.addf %231, %227 : vector<2x32xf32>
      %233 = arith.negf %232 : vector<2x32xf32>
      %234 = math.exp %233 : vector<2x32xf32>
      %cst_90 = arith.constant 1.000000e+00 : f32
      %235 = vector.broadcast %cst_90 : f32 to vector<2x32xf32>
      %236 = arith.addf %235, %234 : vector<2x32xf32>
      %237 = arith.divf %235, %236 : vector<2x32xf32>
      %238 = vector.extract_strided_slice %50 {offsets = [0, 4, 0], sizes = [2, 1, 32], strides = [1, 1, 1]} : vector<2x8x32xf32> to vector<2x1x32xf32>
      %239 = vector.shape_cast %238 : vector<2x1x32xf32> to vector<2x32xf32>
      %240 = arith.addf %239, %228 : vector<2x32xf32>
      %241 = arith.negf %240 : vector<2x32xf32>
      %242 = math.exp %241 : vector<2x32xf32>
      %cst_91 = arith.constant 1.000000e+00 : f32
      %243 = vector.broadcast %cst_91 : f32 to vector<2x32xf32>
      %244 = arith.addf %243, %242 : vector<2x32xf32>
      %245 = arith.divf %243, %244 : vector<2x32xf32>
      %246 = vector.extract_strided_slice %56 {offsets = [0, 4, 0], sizes = [2, 1, 32], strides = [1, 1, 1]} : vector<2x8x32xf32> to vector<2x1x32xf32>
      %247 = vector.shape_cast %246 : vector<2x1x32xf32> to vector<2x32xf32>
      %248 = vector.broadcast %60 : vector<1x32xf32> to vector<2x32xf32>
      %249 = arith.addf %229, %248 : vector<2x32xf32>
      %250 = arith.mulf %237, %249 : vector<2x32xf32>
      %251 = arith.addf %247, %250 : vector<2x32xf32>
      %252 = math.tanh %251 : vector<2x32xf32>
      %cst_92 = arith.constant 1.000000e+00 : f32
      %253 = vector.broadcast %cst_92 : f32 to vector<2x32xf32>
      %254 = arith.subf %253, %245 : vector<2x32xf32>
      %255 = arith.mulf %254, %252 : vector<2x32xf32>
      %256 = arith.mulf %245, %221 : vector<2x32xf32>
      %257 = arith.addf %255, %256 : vector<2x32xf32>
      %258 = vector.extract_strided_slice %64 {offsets = [0, 4], sizes = [2, 1], strides = [1, 1]} : vector<2x8xi1> to vector<2x1xi1>
      %259 = vector.shape_cast %258 : vector<2x1xi1> to vector<2x1xi1>
      %260 = vector.broadcast %259 : vector<2x1xi1> to vector<2x32xi1>
      %261 = arith.select %260, %257, %221 : vector<2x32xi1>, vector<2x32xf32>
      %cst_93 = arith.constant 0.000000e+00 : f32
      %262 = vector.shape_cast %258 : vector<2x1xi1> to vector<2x1xi1>
      %263 = vector.broadcast %262 : vector<2x1xi1> to vector<2x32xi1>
      %264 = vector.broadcast %cst_93 : f32 to vector<2x32xf32>
      %265 = arith.select %263, %257, %264 : vector<2x32xi1>, vector<2x32xf32>
      %266 = arith.truncf %261 : vector<2x32xf32> to vector<2x32xbf16>
      %cst_94 = arith.constant dense<0.000000e+00> : vector<2x32xf32>
      %267 = tpu.matmul %266, %57, %cst_94 {dimension_numbers = #tpu.dot_dimension_numbers<[1], [0], [0], [1], [0, 0, 1, 1], [], []>} : vector<2x32xbf16>, vector<32x32xbf16>, vector<2x32xf32> -> vector<2x32xf32>
      %cst_95 = arith.constant dense<0.000000e+00> : vector<2x32xf32>
      %268 = tpu.matmul %266, %58, %cst_95 {dimension_numbers = #tpu.dot_dimension_numbers<[1], [0], [0], [1], [0, 0, 1, 1], [], []>} : vector<2x32xbf16>, vector<32x32xbf16>, vector<2x32xf32> -> vector<2x32xf32>
      %cst_96 = arith.constant dense<0.000000e+00> : vector<2x32xf32>
      %269 = tpu.matmul %266, %59, %cst_96 {dimension_numbers = #tpu.dot_dimension_numbers<[1], [0], [0], [1], [0, 0, 1, 1], [], []>} : vector<2x32xbf16>, vector<32x32xbf16>, vector<2x32xf32> -> vector<2x32xf32>
      %270 = vector.extract_strided_slice %44 {offsets = [0, 5, 0], sizes = [2, 1, 32], strides = [1, 1, 1]} : vector<2x8x32xf32> to vector<2x1x32xf32>
      %271 = vector.shape_cast %270 : vector<2x1x32xf32> to vector<2x32xf32>
      %272 = arith.addf %271, %267 : vector<2x32xf32>
      %273 = arith.negf %272 : vector<2x32xf32>
      %274 = math.exp %273 : vector<2x32xf32>
      %cst_97 = arith.constant 1.000000e+00 : f32
      %275 = vector.broadcast %cst_97 : f32 to vector<2x32xf32>
      %276 = arith.addf %275, %274 : vector<2x32xf32>
      %277 = arith.divf %275, %276 : vector<2x32xf32>
      %278 = vector.extract_strided_slice %50 {offsets = [0, 5, 0], sizes = [2, 1, 32], strides = [1, 1, 1]} : vector<2x8x32xf32> to vector<2x1x32xf32>
      %279 = vector.shape_cast %278 : vector<2x1x32xf32> to vector<2x32xf32>
      %280 = arith.addf %279, %268 : vector<2x32xf32>
      %281 = arith.negf %280 : vector<2x32xf32>
      %282 = math.exp %281 : vector<2x32xf32>
      %cst_98 = arith.constant 1.000000e+00 : f32
      %283 = vector.broadcast %cst_98 : f32 to vector<2x32xf32>
      %284 = arith.addf %283, %282 : vector<2x32xf32>
      %285 = arith.divf %283, %284 : vector<2x32xf32>
      %286 = vector.extract_strided_slice %56 {offsets = [0, 5, 0], sizes = [2, 1, 32], strides = [1, 1, 1]} : vector<2x8x32xf32> to vector<2x1x32xf32>
      %287 = vector.shape_cast %286 : vector<2x1x32xf32> to vector<2x32xf32>
      %288 = vector.broadcast %60 : vector<1x32xf32> to vector<2x32xf32>
      %289 = arith.addf %269, %288 : vector<2x32xf32>
      %290 = arith.mulf %277, %289 : vector<2x32xf32>
      %291 = arith.addf %287, %290 : vector<2x32xf32>
      %292 = math.tanh %291 : vector<2x32xf32>
      %cst_99 = arith.constant 1.000000e+00 : f32
      %293 = vector.broadcast %cst_99 : f32 to vector<2x32xf32>
      %294 = arith.subf %293, %285 : vector<2x32xf32>
      %295 = arith.mulf %294, %292 : vector<2x32xf32>
      %296 = arith.mulf %285, %261 : vector<2x32xf32>
      %297 = arith.addf %295, %296 : vector<2x32xf32>
      %298 = vector.extract_strided_slice %64 {offsets = [0, 5], sizes = [2, 1], strides = [1, 1]} : vector<2x8xi1> to vector<2x1xi1>
      %299 = vector.shape_cast %298 : vector<2x1xi1> to vector<2x1xi1>
      %300 = vector.broadcast %299 : vector<2x1xi1> to vector<2x32xi1>
      %301 = arith.select %300, %297, %261 : vector<2x32xi1>, vector<2x32xf32>
      %cst_100 = arith.constant 0.000000e+00 : f32
      %302 = vector.shape_cast %298 : vector<2x1xi1> to vector<2x1xi1>
      %303 = vector.broadcast %302 : vector<2x1xi1> to vector<2x32xi1>
      %304 = vector.broadcast %cst_100 : f32 to vector<2x32xf32>
      %305 = arith.select %303, %297, %304 : vector<2x32xi1>, vector<2x32xf32>
      %306 = arith.truncf %301 : vector<2x32xf32> to vector<2x32xbf16>
      %cst_101 = arith.constant dense<0.000000e+00> : vector<2x32xf32>
      %307 = tpu.matmul %306, %57, %cst_101 {dimension_numbers = #tpu.dot_dimension_numbers<[1], [0], [0], [1], [0, 0, 1, 1], [], []>} : vector<2x32xbf16>, vector<32x32xbf16>, vector<2x32xf32> -> vector<2x32xf32>
      %cst_102 = arith.constant dense<0.000000e+00> : vector<2x32xf32>
      %308 = tpu.matmul %306, %58, %cst_102 {dimension_numbers = #tpu.dot_dimension_numbers<[1], [0], [0], [1], [0, 0, 1, 1], [], []>} : vector<2x32xbf16>, vector<32x32xbf16>, vector<2x32xf32> -> vector<2x32xf32>
      %cst_103 = arith.constant dense<0.000000e+00> : vector<2x32xf32>
      %309 = tpu.matmul %306, %59, %cst_103 {dimension_numbers = #tpu.dot_dimension_numbers<[1], [0], [0], [1], [0, 0, 1, 1], [], []>} : vector<2x32xbf16>, vector<32x32xbf16>, vector<2x32xf32> -> vector<2x32xf32>
      %310 = vector.extract_strided_slice %44 {offsets = [0, 6, 0], sizes = [2, 1, 32], strides = [1, 1, 1]} : vector<2x8x32xf32> to vector<2x1x32xf32>
      %311 = vector.shape_cast %310 : vector<2x1x32xf32> to vector<2x32xf32>
      %312 = arith.addf %311, %307 : vector<2x32xf32>
      %313 = arith.negf %312 : vector<2x32xf32>
      %314 = math.exp %313 : vector<2x32xf32>
      %cst_104 = arith.constant 1.000000e+00 : f32
      %315 = vector.broadcast %cst_104 : f32 to vector<2x32xf32>
      %316 = arith.addf %315, %314 : vector<2x32xf32>
      %317 = arith.divf %315, %316 : vector<2x32xf32>
      %318 = vector.extract_strided_slice %50 {offsets = [0, 6, 0], sizes = [2, 1, 32], strides = [1, 1, 1]} : vector<2x8x32xf32> to vector<2x1x32xf32>
      %319 = vector.shape_cast %318 : vector<2x1x32xf32> to vector<2x32xf32>
      %320 = arith.addf %319, %308 : vector<2x32xf32>
      %321 = arith.negf %320 : vector<2x32xf32>
      %322 = math.exp %321 : vector<2x32xf32>
      %cst_105 = arith.constant 1.000000e+00 : f32
      %323 = vector.broadcast %cst_105 : f32 to vector<2x32xf32>
      %324 = arith.addf %323, %322 : vector<2x32xf32>
      %325 = arith.divf %323, %324 : vector<2x32xf32>
      %326 = vector.extract_strided_slice %56 {offsets = [0, 6, 0], sizes = [2, 1, 32], strides = [1, 1, 1]} : vector<2x8x32xf32> to vector<2x1x32xf32>
      %327 = vector.shape_cast %326 : vector<2x1x32xf32> to vector<2x32xf32>
      %328 = vector.broadcast %60 : vector<1x32xf32> to vector<2x32xf32>
      %329 = arith.addf %309, %328 : vector<2x32xf32>
      %330 = arith.mulf %317, %329 : vector<2x32xf32>
      %331 = arith.addf %327, %330 : vector<2x32xf32>
      %332 = math.tanh %331 : vector<2x32xf32>
      %cst_106 = arith.constant 1.000000e+00 : f32
      %333 = vector.broadcast %cst_106 : f32 to vector<2x32xf32>
      %334 = arith.subf %333, %325 : vector<2x32xf32>
      %335 = arith.mulf %334, %332 : vector<2x32xf32>
      %336 = arith.mulf %325, %301 : vector<2x32xf32>
      %337 = arith.addf %335, %336 : vector<2x32xf32>
      %338 = vector.extract_strided_slice %64 {offsets = [0, 6], sizes = [2, 1], strides = [1, 1]} : vector<2x8xi1> to vector<2x1xi1>
      %339 = vector.shape_cast %338 : vector<2x1xi1> to vector<2x1xi1>
      %340 = vector.broadcast %339 : vector<2x1xi1> to vector<2x32xi1>
      %341 = arith.select %340, %337, %301 : vector<2x32xi1>, vector<2x32xf32>
      %cst_107 = arith.constant 0.000000e+00 : f32
      %342 = vector.shape_cast %338 : vector<2x1xi1> to vector<2x1xi1>
      %343 = vector.broadcast %342 : vector<2x1xi1> to vector<2x32xi1>
      %344 = vector.broadcast %cst_107 : f32 to vector<2x32xf32>
      %345 = arith.select %343, %337, %344 : vector<2x32xi1>, vector<2x32xf32>
      %346 = arith.truncf %341 : vector<2x32xf32> to vector<2x32xbf16>
      %cst_108 = arith.constant dense<0.000000e+00> : vector<2x32xf32>
      %347 = tpu.matmul %346, %57, %cst_108 {dimension_numbers = #tpu.dot_dimension_numbers<[1], [0], [0], [1], [0, 0, 1, 1], [], []>} : vector<2x32xbf16>, vector<32x32xbf16>, vector<2x32xf32> -> vector<2x32xf32>
      %cst_109 = arith.constant dense<0.000000e+00> : vector<2x32xf32>
      %348 = tpu.matmul %346, %58, %cst_109 {dimension_numbers = #tpu.dot_dimension_numbers<[1], [0], [0], [1], [0, 0, 1, 1], [], []>} : vector<2x32xbf16>, vector<32x32xbf16>, vector<2x32xf32> -> vector<2x32xf32>
      %cst_110 = arith.constant dense<0.000000e+00> : vector<2x32xf32>
      %349 = tpu.matmul %346, %59, %cst_110 {dimension_numbers = #tpu.dot_dimension_numbers<[1], [0], [0], [1], [0, 0, 1, 1], [], []>} : vector<2x32xbf16>, vector<32x32xbf16>, vector<2x32xf32> -> vector<2x32xf32>
      %350 = vector.extract_strided_slice %44 {offsets = [0, 7, 0], sizes = [2, 1, 32], strides = [1, 1, 1]} : vector<2x8x32xf32> to vector<2x1x32xf32>
      %351 = vector.shape_cast %350 : vector<2x1x32xf32> to vector<2x32xf32>
      %352 = arith.addf %351, %347 : vector<2x32xf32>
      %353 = arith.negf %352 : vector<2x32xf32>
      %354 = math.exp %353 : vector<2x32xf32>
      %cst_111 = arith.constant 1.000000e+00 : f32
      %355 = vector.broadcast %cst_111 : f32 to vector<2x32xf32>
      %356 = arith.addf %355, %354 : vector<2x32xf32>
      %357 = arith.divf %355, %356 : vector<2x32xf32>
      %358 = vector.extract_strided_slice %50 {offsets = [0, 7, 0], sizes = [2, 1, 32], strides = [1, 1, 1]} : vector<2x8x32xf32> to vector<2x1x32xf32>
      %359 = vector.shape_cast %358 : vector<2x1x32xf32> to vector<2x32xf32>
      %360 = arith.addf %359, %348 : vector<2x32xf32>
      %361 = arith.negf %360 : vector<2x32xf32>
      %362 = math.exp %361 : vector<2x32xf32>
      %cst_112 = arith.constant 1.000000e+00 : f32
      %363 = vector.broadcast %cst_112 : f32 to vector<2x32xf32>
      %364 = arith.addf %363, %362 : vector<2x32xf32>
      %365 = arith.divf %363, %364 : vector<2x32xf32>
      %366 = vector.extract_strided_slice %56 {offsets = [0, 7, 0], sizes = [2, 1, 32], strides = [1, 1, 1]} : vector<2x8x32xf32> to vector<2x1x32xf32>
      %367 = vector.shape_cast %366 : vector<2x1x32xf32> to vector<2x32xf32>
      %368 = vector.broadcast %60 : vector<1x32xf32> to vector<2x32xf32>
      %369 = arith.addf %349, %368 : vector<2x32xf32>
      %370 = arith.mulf %357, %369 : vector<2x32xf32>
      %371 = arith.addf %367, %370 : vector<2x32xf32>
      %372 = math.tanh %371 : vector<2x32xf32>
      %cst_113 = arith.constant 1.000000e+00 : f32
      %373 = vector.broadcast %cst_113 : f32 to vector<2x32xf32>
      %374 = arith.subf %373, %365 : vector<2x32xf32>
      %375 = arith.mulf %374, %372 : vector<2x32xf32>
      %376 = arith.mulf %365, %341 : vector<2x32xf32>
      %377 = arith.addf %375, %376 : vector<2x32xf32>
      %378 = vector.extract_strided_slice %64 {offsets = [0, 7], sizes = [2, 1], strides = [1, 1]} : vector<2x8xi1> to vector<2x1xi1>
      %cst_114 = arith.constant 0.000000e+00 : f32
      %379 = vector.shape_cast %378 : vector<2x1xi1> to vector<2x1xi1>
      %380 = vector.broadcast %379 : vector<2x1xi1> to vector<2x32xi1>
      %381 = vector.broadcast %cst_114 : f32 to vector<2x32xf32>
      %382 = arith.select %380, %377, %381 : vector<2x32xi1>, vector<2x32xf32>
      %383 = vector.shape_cast %105 : vector<2x32xf32> to vector<2x1x32xf32>
      %384 = vector.shape_cast %145 : vector<2x32xf32> to vector<2x1x32xf32>
      %385 = vector.shape_cast %185 : vector<2x32xf32> to vector<2x1x32xf32>
      %386 = vector.shape_cast %225 : vector<2x32xf32> to vector<2x1x32xf32>
      %387 = vector.shape_cast %265 : vector<2x32xf32> to vector<2x1x32xf32>
      %388 = vector.shape_cast %305 : vector<2x32xf32> to vector<2x1x32xf32>
      %389 = vector.shape_cast %345 : vector<2x32xf32> to vector<2x1x32xf32>
      %390 = vector.shape_cast %382 : vector<2x32xf32> to vector<2x1x32xf32>
      %391 = tpu.concatenate %383, %384, %385, %386, %387, %388, %389, %390 in 1 : vector<2x1x32xf32>, vector<2x1x32xf32>, vector<2x1x32xf32>, vector<2x1x32xf32>, vector<2x1x32xf32>, vector<2x1x32xf32>, vector<2x1x32xf32>, vector<2x1x32xf32> -> vector<2x8x32xf32>
      %392 = vector.shape_cast %391 : vector<2x8x32xf32> to vector<16x32xf32>
      %393 = arith.truncf %392 : vector<16x32xf32> to vector<16x32xbf16>
      %394 = arith.truncf %37 : vector<2x16xf32> to vector<2x16xbf16>
      %c0_115 = arith.constant 0 : index
      %c0_116 = arith.constant 0 : index
      %395 = vector.load %arg22[%c0_115, %c0_116] : memref<16x32xbf16, #tpu.memory_space<vmem>>, vector<16x32xbf16>
      %cst_117 = arith.constant dense<0.000000e+00> : vector<2x32xf32>
      %396 = tpu.matmul %394, %395, %cst_117 {dimension_numbers = #tpu.dot_dimension_numbers<[1], [0], [0], [1], [0, 0, 1, 1], [], []>} : vector<2x16xbf16>, vector<16x32xbf16>, vector<2x32xf32> -> vector<2x32xf32>
      %c0_118 = arith.constant 0 : index
      %c0_119 = arith.constant 0 : index
      %397 = vector.load %arg23[%c0_118, %c0_119] : memref<1x32xf32, #tpu.memory_space<vmem>>, vector<1x32xf32>
      %398 = vector.broadcast %397 : vector<1x32xf32> to vector<2x32xf32>
      %399 = arith.addf %396, %398 : vector<2x32xf32>
      %c0_120 = arith.constant 0 : index
      %c0_121 = arith.constant 0 : index
      %400 = vector.load %arg21[%c0_120, %c0_121] : memref<32x32xbf16, #tpu.memory_space<vmem>>, vector<32x32xbf16>
      %cst_122 = arith.constant dense<0.000000e+00> : vector<16x32xf32>
      %401 = tpu.matmul %393, %400, %cst_122 {dimension_numbers = #tpu.dot_dimension_numbers<[1], [0], [0], [1], [0, 0, 1, 1], [], []>} : vector<16x32xbf16>, vector<32x32xbf16>, vector<16x32xf32> -> vector<16x32xf32>
      %402 = vector.shape_cast %401 : vector<16x32xf32> to vector<2x8x32xf32>
      %403 = vector.shape_cast %399 : vector<2x32xf32> to vector<2x1x32xf32>
      %404 = vector.broadcast %403 : vector<2x1x32xf32> to vector<2x8x32xf32>
      %405 = arith.addf %402, %404 : vector<2x8x32xf32>
      %406 = math.tanh %405 : vector<2x8x32xf32>
      %407 = vector.shape_cast %406 : vector<2x8x32xf32> to vector<16x32xf32>
      %408 = arith.truncf %407 : vector<16x32xf32> to vector<16x32xbf16>
      %c0_123 = arith.constant 0 : index
      %c0_124 = arith.constant 0 : index
      %409 = vector.load %arg29[%c0_123, %c0_124] : memref<16x32xbf16, #tpu.memory_space<vmem>>, vector<16x32xbf16>
      tpu.vector_store %arg29[%c0_123, %c0_124], %408 {strides = array<i32>} : memref<16x32xbf16, #tpu.memory_space<vmem>>, vector<16x32xbf16>,
    } else {
    }
    %c0 = arith.constant 0 : index
    %c0_1 = arith.constant 0 : index
    %3 = vector.load %arg29[%c0, %c0_1] : memref<16x32xbf16, #tpu.memory_space<vmem>>, vector<16x32xbf16>
    %c0_2 = arith.constant 0 : index
    %c0_3 = arith.constant 0 : index
    %4 = vector.load %arg24[%c0_2, %c0_3] : memref<32x128xbf16, #tpu.memory_space<vmem>>, vector<32x128xbf16>
    %cst = arith.constant dense<0.000000e+00> : vector<16x128xf32>
    %5 = tpu.matmul %3, %4, %cst {dimension_numbers = #tpu.dot_dimension_numbers<[1], [0], [0], [1], [0, 0, 1, 1], [], []>} : vector<16x32xbf16>, vector<32x128xbf16>, vector<16x128xf32> -> vector<16x128xf32>
    %c0_4 = arith.constant 0 : index
    %c0_5 = arith.constant 0 : index
    %6 = vector.load %arg25[%c0_4, %c0_5] : memref<1x128xf32, #tpu.memory_space<vmem>>, vector<1x128xf32>
    %7 = vector.broadcast %6 : vector<1x128xf32> to vector<16x128xf32>
    %8 = arith.addf %5, %7 : vector<16x128xf32>
    %c0_6 = arith.constant 0 : index
    %c0_7 = arith.constant 0 : index
    %9 = vector.load %arg26[%c0_6, %c0_7] : memref<16x128xf32, #tpu.memory_space<vmem>>, vector<16x128xf32>
    tpu.vector_store %arg26[%c0_6, %c0_7], %8 {strides = array<i32>} : memref<16x128xf32, #tpu.memory_space<vmem>>, vector<16x128xf32>,
    return
  }
  func.func @transform_0(%arg0: i32, %arg1: i32) -> (i32, i32, i32) {
    %c0_i32 = arith.constant 0 : i32
    %c0_i32_0 = arith.constant 0 : i32
    %c0_i32_1 = arith.constant 0 : i32
    return %arg0, %c0_i32, %c0_i32_0 : i32, i32, i32
  }
  func.func @transform_1(%arg0: i32, %arg1: i32) -> (i32, i32) {
    %c0_i32 = arith.constant 0 : i32
    %c0_i32_0 = arith.constant 0 : i32
    return %arg0, %c0_i32 : i32, i32
  }
  func.func @transform_2(%arg0: i32, %arg1: i32) -> (i32, i32) {
    %c0_i32 = arith.constant 0 : i32
    %c0_i32_0 = arith.constant 0 : i32
    return %arg0, %c0_i32 : i32, i32
  }
  func.func @transform_3(%arg0: i32, %arg1: i32) -> (i32, i32) {
    %c0_i32 = arith.constant 0 : i32
    %c0_i32_0 = arith.constant 0 : i32
    %c0_i32_1 = arith.constant 0 : i32
    return %c0_i32, %c0_i32_0 : i32, i32
  }
  func.func @transform_4(%arg0: i32, %arg1: i32) -> (i32, i32) {
    %c0_i32 = arith.constant 0 : i32
    %c0_i32_0 = arith.constant 0 : i32
    %c0_i32_1 = arith.constant 0 : i32
    return %c0_i32, %c0_i32_0 : i32, i32
  }
  func.func @transform_5(%arg0: i32, %arg1: i32) -> (i32, i32) {
    %c0_i32 = arith.constant 0 : i32
    %c0_i32_0 = arith.constant 0 : i32
    %c0_i32_1 = arith.constant 0 : i32
    return %c0_i32, %c0_i32_0 : i32, i32
  }
  func.func @transform_6(%arg0: i32, %arg1: i32) -> (i32, i32) {
    %c0_i32 = arith.constant 0 : i32
    %c0_i32_0 = arith.constant 0 : i32
    %c0_i32_1 = arith.constant 0 : i32
    return %c0_i32, %c0_i32_0 : i32, i32
  }
  func.func @transform_7(%arg0: i32, %arg1: i32) -> (i32, i32) {
    %c0_i32 = arith.constant 0 : i32
    %c0_i32_0 = arith.constant 0 : i32
    %c0_i32_1 = arith.constant 0 : i32
    return %c0_i32, %c0_i32_0 : i32, i32
  }
  func.func @transform_8(%arg0: i32, %arg1: i32) -> (i32, i32) {
    %c0_i32 = arith.constant 0 : i32
    %c0_i32_0 = arith.constant 0 : i32
    %c0_i32_1 = arith.constant 0 : i32
    return %c0_i32, %c0_i32_0 : i32, i32
  }
  func.func @transform_9(%arg0: i32, %arg1: i32) -> (i32, i32) {
    %c0_i32 = arith.constant 0 : i32
    %c0_i32_0 = arith.constant 0 : i32
    %c0_i32_1 = arith.constant 0 : i32
    return %c0_i32, %c0_i32_0 : i32, i32
  }
  func.func @transform_10(%arg0: i32, %arg1: i32) -> (i32, i32) {
    %c0_i32 = arith.constant 0 : i32
    %c0_i32_0 = arith.constant 0 : i32
    %c0_i32_1 = arith.constant 0 : i32
    return %c0_i32, %c0_i32_0 : i32, i32
  }
  func.func @transform_11(%arg0: i32, %arg1: i32) -> (i32, i32) {
    %c0_i32 = arith.constant 0 : i32
    %c0_i32_0 = arith.constant 0 : i32
    %c0_i32_1 = arith.constant 0 : i32
    return %c0_i32, %c0_i32_0 : i32, i32
  }
  func.func @transform_12(%arg0: i32, %arg1: i32) -> (i32, i32) {
    %c0_i32 = arith.constant 0 : i32
    %c0_i32_0 = arith.constant 0 : i32
    %c0_i32_1 = arith.constant 0 : i32
    return %c0_i32, %c0_i32_0 : i32, i32
  }
  func.func @transform_13(%arg0: i32, %arg1: i32) -> (i32, i32) {
    %c0_i32 = arith.constant 0 : i32
    %c0_i32_0 = arith.constant 0 : i32
    %c0_i32_1 = arith.constant 0 : i32
    return %c0_i32, %c0_i32_0 : i32, i32
  }
  func.func @transform_14(%arg0: i32, %arg1: i32) -> (i32, i32) {
    %c0_i32 = arith.constant 0 : i32
    %c0_i32_0 = arith.constant 0 : i32
    %c0_i32_1 = arith.constant 0 : i32
    return %c0_i32, %c0_i32_0 : i32, i32
  }
  func.func @transform_15(%arg0: i32, %arg1: i32) -> (i32, i32) {
    %c0_i32 = arith.constant 0 : i32
    %c0_i32_0 = arith.constant 0 : i32
    %c0_i32_1 = arith.constant 0 : i32
    return %c0_i32, %c0_i32_0 : i32, i32
  }
  func.func @transform_16(%arg0: i32, %arg1: i32) -> (i32, i32) {
    %c0_i32 = arith.constant 0 : i32
    %c0_i32_0 = arith.constant 0 : i32
    %c0_i32_1 = arith.constant 0 : i32
    return %c0_i32, %c0_i32_0 : i32, i32
  }
  func.func @transform_17(%arg0: i32, %arg1: i32) -> (i32, i32) {
    %c0_i32 = arith.constant 0 : i32
    %c0_i32_0 = arith.constant 0 : i32
    %c0_i32_1 = arith.constant 0 : i32
    return %c0_i32, %c0_i32_0 : i32, i32
  }
  func.func @transform_18(%arg0: i32, %arg1: i32) -> (i32, i32) {
    %c0_i32 = arith.constant 0 : i32
    %c0_i32_0 = arith.constant 0 : i32
    %c0_i32_1 = arith.constant 0 : i32
    return %c0_i32, %c0_i32_0 : i32, i32
  }
  func.func @transform_19(%arg0: i32, %arg1: i32) -> (i32, i32) {
    %c0_i32 = arith.constant 0 : i32
    %c0_i32_0 = arith.constant 0 : i32
    %c0_i32_1 = arith.constant 0 : i32
    return %c0_i32, %c0_i32_0 : i32, i32
  }
  func.func @transform_20(%arg0: i32, %arg1: i32) -> (i32, i32) {
    %c0_i32 = arith.constant 0 : i32
    %c0_i32_0 = arith.constant 0 : i32
    %c0_i32_1 = arith.constant 0 : i32
    return %c0_i32, %c0_i32_0 : i32, i32
  }
  func.func @transform_21(%arg0: i32, %arg1: i32) -> (i32, i32) {
    %c0_i32 = arith.constant 0 : i32
    %c0_i32_0 = arith.constant 0 : i32
    %c0_i32_1 = arith.constant 0 : i32
    return %c0_i32, %c0_i32_0 : i32, i32
  }
  func.func @transform_22(%arg0: i32, %arg1: i32) -> (i32, i32) {
    %c0_i32 = arith.constant 0 : i32
    %c0_i32_0 = arith.constant 0 : i32
    return %c0_i32, %arg1 : i32, i32
  }
  func.func @transform_23(%arg0: i32, %arg1: i32) -> (i32, i32) {
    %c0_i32 = arith.constant 0 : i32
    %c0_i32_0 = arith.constant 0 : i32
    return %c0_i32, %arg1 : i32, i32
  }
  func.func @transform_24(%arg0: i32, %arg1: i32) -> (i32, i32) {
    %c0_i32 = arith.constant 0 : i32
    return %arg0, %arg1 : i32, i32
  }
  func.func @transform_25(%arg0: i32, %arg1: i32) -> (i32, i32) {
    %c0_i32 = arith.constant 0 : i32
    %c0_i32_0 = arith.constant 0 : i32
    return %arg0, %c0_i32 : i32, i32
  }
  func.func @transform_26(%arg0: i32, %arg1: i32) -> (i32, i32) {
    %c0_i32 = arith.constant 0 : i32
    %c0_i32_0 = arith.constant 0 : i32
    return %arg0, %c0_i32 : i32, i32
  }
}

</mosaic_0001>

<bundles_post_ra>
// kernel: model_pe_forward.1
= control target key start
LH: loop header
LB: loop body
LE: loop exit
PB: predicated region body
PF: predicated region fallthrough
CT: control target
= control target key end

     0   :  { %s4142_s0 = inlined_call_operand.vmem [shape: bf16[2,8,32], index: 0, kind: input, shape index: {}]   ;;  %s4143_s1 = inlined_call_operand.vmem [shape: s32[2,1], index: 1, kind: input, shape index: {}]   ;;  %s4144_s2 = inlined_call_operand.vmem [shape: f32[2,16], index: 2, kind: input, shape index: {}]   ;;  %s4145_s3 = inlined_call_operand.vmem [shape: bf16[32,32], index: 3, kind: input, shape index: {}]   ;;  %s4146_s4 = inlined_call_operand.vmem [shape: f32[1,32], index: 4, kind: input, shape index: {}]   ;;  %s4147_s5 = inlined_call_operand.vmem [shape: bf16[32,16], index: 5, kind: input, shape index: {}]   ;;  %s4148_s6 = inlined_call_operand.vmem [shape: f32[1,16], index: 6, kind: input, shape index: {}]   ;;  %s4149_s7 = inlined_call_operand.vmem [shape: bf16[32,16], index: 7, kind: input, shape index: {}]   ;;  %s4150_s8 = inlined_call_operand.vmem [shape: f32[1,16], index: 8, kind: input, shape index: {}]   ;;  %s4151_s9 = inlined_call_operand.vmem [shape: bf16[32,32], index: 9, kind: input, shape index: {}]   ;;  %s4152_s10 = inlined_call_operand.vmem [shape: bf16[32,32], index: 10, kind: input, shape index: {}]   ;;  %s4153_s11 = inlined_call_operand.vmem [shape: bf16[32,32], index: 11, kind: input, shape index: {}]   ;;  %s4154_s12 = inlined_call_operand.vmem [shape: bf16[32,32], index: 12, kind: input, shape index: {}]   ;;  %s4155_s13 = inlined_call_operand.vmem [shape: bf16[32,32], index: 13, kind: input, shape index: {}]   ;;  %s4156_s14 = inlined_call_operand.vmem [shape: bf16[32,32], index: 14, kind: input, shape index: {}]   ;;  %s4157_s15 = inlined_call_operand.vmem [shape: f32[1,32], index: 15, kind: input, shape index: {}]   ;;  %s4158_s16 = inlined_call_operand.vmem [shape: f32[1,32], index: 16, kind: input, shape index: {}]   ;;  %s4159_s17 = inlined_call_operand.vmem [shape: f32[1,32], index: 17, kind: input, shape index: {}]   ;;  %s4160_s18 = inlined_call_operand.vmem [shape: f32[1,32], index: 18, kind: input, shape index: {}]   ;;  %s4161_s19 = inlined_call_operand.vmem [shape: bf16[32,32], index: 19, kind: input, shape index: {}]   ;;  %s4162_s20 = inlined_call_operand.vmem [shape: bf16[16,32], index: 20, kind: input, shape index: {}]   ;;  %s4163_s21 = inlined_call_operand.vmem [shape: f32[1,32], index: 21, kind: input, shape index: {}]   ;;  %s4164_s22 = inlined_call_operand.vmem [shape: bf16[32,128], index: 22, kind: input, shape index: {}]   ;;  %s4165_s23 = inlined_call_operand.vmem [shape: f32[1,128], index: 23, kind: input, shape index: {}]   ;;  %s4166_s24 = inlined_call_operand.hbm [shape: f32[16,128], index: 24, kind: output, shape index: {0}]   ;;  %s4167_s25 = inlined_call_operand.vmem [shape: f32[2,16], index: 25, kind: output, shape index: {1}]   ;;  %s4168_s26 = inlined_call_operand.vmem [shape: f32[2,16], index: 26, kind: output, shape index: {2}]  }
   0x1   :  { %4174 = sst [smem:[#allocation6_spill]] %s4142_s0 }
   0x2   :  { %4175 = sst [smem:[#allocation7_spill]] %s4143_s1 }
   0x3   :  { %4176 = sst [smem:[#allocation8_spill]] %s4144_s2 }
   0x4   :  { %4177 = sst [smem:[#allocation9_spill]] %s4145_s3 }
   0x5   :  { %4178 = sst [smem:[#allocation10_spill]] %s4146_s4 }
   0x6   :  { %4179 = sst [smem:[#allocation11_spill]] %s4147_s5 }
   0x7   :  { %4180 = sst [smem:[#allocation12_spill]] %s4148_s6 }
   0x8   :  { %4181 = sst [smem:[#allocation13_spill]] %s4149_s7 }
   0x9   :  { %4182 = sst [smem:[#allocation14_spill]] %s4150_s8 }
   0xa   :  { %4183 = sst [smem:[#allocation15_spill]] %s4151_s9 }
   0xb   :  { %4184 = sst [smem:[#allocation16_spill]] %s4152_s10 }
   0xc   :  { %s4185_s7 = sld [smem:[#allocation9_spill]]  ;;  %v3383_v1 = vmov 0.0   ;;  %vm3384_vm0 = vmmov 0   ;;  %s4186_s0 = sld [smem:[#allocation6_spill]]  ;;  %vm90_vm1 = vcmask 260096   ;;  %v3385_v6 = vmov 0  }
   0xd   :  { %2874 = vmatprep.subr.bf16.mxu0 %v3383_v1  ;;  %2882 = vmatprep.subr.bf16.mxu1 %v3383_v1  ;;  %s4187_s2 = sld [smem:[#allocation7_spill]]  ;;  %vm122_vm2 = vcmask 1041409  }
   0xe   :  { %2878 = vmatprep.mubr.msk.bf16.mxu0 %vm3384_vm0, %v3383_v1  ;;  %3150 = vset.pattern.permute.xlu0 %v3385_v6 }
   0xf   :  { %2886 = vmatprep.mubr.msk.bf16.mxu1 %vm3384_vm0, %v3383_v1 }
  0x12   :  { %v3159_v0 = vld [vmem:[%s4185_s7] sm:$0xff]   ;;  %v3160_v2 = vld [vmem:[%s4185_s7 + $0x8] sm:$0xff]  }
  0x13   :  { %2875 = vmatpush3.bf16.msra.mxu0 %v3159_v0  ;;  %v3545_v3 = vld [vmem:[%s4186_s0] sm:$0xff]  }
  0x14   :  { %2876 = vmatprep.subr.bf16.mxu0 %v3383_v1  ;;  %v88_v4 = vunpack.c.l.bf16 %v3545_v3  ;;  %v89_v5 = vunpack.c.h.bf16 %v3545_v3  ;;  %v535_v7 = vld [vmem:[%s4187_s2] sm:$0x3] }
  0x15   :  { %537 = vperm.xlu0 %3150, %v535_v7  }
  0x16   :  { %v91_v8 = vsel %vm90_vm1, %v88_v4, 0.0  ;;  %v98_v9 = vsel %vm90_vm1, %v89_v5, 0.0 }
  0x17   :  { %2877 = vmatpush3.bf16.msra.mxu0 %v3160_v2  ;;  %v92_v10 = vrot.slane %v91_v8, 4  ;;  %v99_v11 = vrot.slane %v98_v9, 4 }
  0x18   :  { %2890 = vmatprep.subr.bf16.mxu0 %v3383_v1 }
  0x19   :  { %v93_v12 = vadd.f32 %v92_v10, %v91_v8  ;;  %v100_v13 = vadd.f32 %v99_v11, %v98_v9 }
  0x1b   :  { %v94_v14 = vrot.slane %v93_v12, 2  ;;  %v101_v15 = vrot.slane %v100_v13, 2 }
  0x1d   :  { %v95_v16 = vadd.f32 %v94_v14, %v93_v12  ;;  %v102_v17 = vadd.f32 %v101_v15, %v100_v13 }
  0x1f   :  { %v96_v18 = vrot.slane %v95_v16, 1  ;;  %v103_v19 = vrot.slane %v102_v17, 1 }
  0x21   :  { %v97_v20 = vadd.f32 %v96_v18, %v95_v16  ;;  %v104_v21 = vadd.f32 %v103_v19, %v102_v17 }
  0x23   :  { %v105_v22 = vpack.c.bf16 %v97_v20, %v97_v20  ;;  %v106_v23 = vpack.c.bf16 %v104_v21, %v104_v21 }
  0x24   :  { %32 = vsyncpa [#allocation4], 0  ;;  %vm137_vm3 = vcmask 261120   ;;  %s4188_s6 = sld [smem:[#allocation13_spill]]  ;;  %s4189_s3 = sld [smem:[#allocation11_spill]]  ;;  %v533_v32 = vlaneseq  ;;  %v3386_v36 = vmov 1  }
  0x25   :  { %v120_v24 = vunpack.c.l.b16 %v105_v22  ;;  %v121_v25 = vunpack.c.l.b16 %v106_v23  ;;  %3151 = vset.pattern.permute.xlu1 %v3386_v36  ;;  %v3387_v37 = vmov 3   ;;  %v3388_v38 = vmov 2   ;;  %s4190_s9 = sld [smem:[#allocation10_spill]]  ;;  %s4191_s5 = sld [smem:[#allocation16_spill]]  ;;  %v3605_v55 = vld [vmem:[%s4154_s12] sm:$0xff]   ;;  %v3620_v57 = vld [vmem:[%s4154_s12 + $0x8] sm:$0xff]  }
  0x26   :  { %v534_v34 = vand.u32 127, %v533_v32  ;;  %v3389_v39 = vmov 6   ;;  %v3390_v40 = vmov 4   ;;  %v3391_v41 = vmov 7   ;;  %s4192_s1 = sld [smem:[#allocation15_spill]]  ;;  %v3171_v56 = vld [vmem:[%s4153_s11] sm:$0xff]  }
  0x27   :  { %v123_v26 = vsel %vm122_vm2, %v121_v25, %v120_v24  ;;  %v3392_v42 = vmov 5   ;;  %v3173_v58 = vld [vmem:[%s4153_s11 + $0x8] sm:$0xff]   ;;  %v3635_v59 = vld [vmem:[%s4155_s13] sm:$0xff]   ;;  %s4193_s29 = sld [smem:[#allocation12_spill]]  ;;  %s4194_s30 = sld [smem:[#allocation14_spill]]  ;;  %vm312_vm5 = vcmask 123904  }
  0x28   :  { %v124_v27 = vpack.c.b16 %v123_v26, %v123_v26  ;;  %v3642_v60 = vld [vmem:[%s4156_s14] sm:$0xff]   ;;  %v3651_v61 = vld [vmem:[%s4155_s13 + $0x8] sm:$0xff]   ;;  %vm2405_vm9 = vcmask 1040384   ;;  %vm2408_vm10 = vcmask 1041408   ;;  %vm2411_vm12 = vcmask 1042432   ;;  %s3394_s8 = smov [#allocation3]  }
  0x29   :  { %v3660_v62 = vld [vmem:[%s4156_s14 + $0x8] sm:$0xff]   ;;  %v2693_v17 = vld [vmem:[%s4157_s15] ss:$0 sm:$0xff]  ;;  %vm2414_vm14 = vcmask 1043456   ;;  %vm2417_vm1 = vcmask 1044480  }
  0x2a   :  { %2879 = vmatmul.mubr.msk.bf16.vlgmr.msra.gmra.mrb[0].mxu0 %vm137_vm3, %v124_v27  ;;  %v3161_v28 = vld [vmem:[%s4188_s6] sm:$0xff]   ;;  %v3163_v30 = vld [vmem:[%s4188_s6 + $0x8] sm:$0xff]  }
  0x2b   :  { %2894 = vmatprep.mubr.msk.bf16.mxu0 %vm3384_vm0, %v3383_v1  ;;  %v3162_v29 = vld [vmem:[%s4189_s3] sm:$0xff]   ;;  %2891 = vmatpush3.bf16.msra.mxu0 %v3161_v28  ;;  %v3164_v31 = vld [vmem:[%s4189_s3 + $0x8] sm:$0xff]   ;;  %s4195_s3 = sld [smem:[#allocation8_spill]] }
  0x2c   :  { %2883 = vmatpush3.bf16.msra.mxu1 %v3162_v29  ;;  %2892 = vmatprep.subr.bf16.mxu0 %v3383_v1  ;;  %v2681_v43 = vld [vmem:[%s4190_s9] ss:$0 sm:$0xff]  ;;  %v3167_v53 = vld [vmem:[%s4191_s5 + $0x8] sm:$0xff]  }
  0x2d   :  { %2884 = vmatprep.subr.bf16.mxu1 %v3383_v1  ;;  %v3165_v50 = vld [vmem:[%s4191_s5] sm:$0xff]   ;;  %v3168_v54 = vld [vmem:[%s4192_s1 + $0x8] sm:$0xff]  }
  0x2e   :  { %v3166_v51 = vld [vmem:[%s4192_s1] sm:$0xff]  }
  0x2f   :  { %2893 = vmatpush3.bf16.msra.mxu0 %v3163_v30  ;;  %v2685_v63 = vld [vmem:[%s4193_s29] ss:$0 sm:$0xff] }
  0x30   :  { %2885 = vmatpush3.bf16.msra.mxu1 %v3164_v31  ;;  %2906 = vmatprep.subr.bf16.mxu0 %v3383_v1  ;;  %v2689_v0 = vld [vmem:[%s4194_s30] ss:$0 sm:$0xff] }
  0x31   :  { %2898 = vmatprep.subr.bf16.mxu1 %v3383_v1  ;;  %v317_v22 = vld [vmem:[%s4195_s3] sm:$0x3] }
  0x94   :  { %v538_v33 = vpop.permute.xlu0 %537 }
  0x95   :  { %vm539_vm4 = vcmp.gt.s32.totalorder %v538_v33, %v534_v34 }
  0x96   :  { %v759_v35 = vsel %vm539_vm4, 1, %v3385_v6 }
  0x97   :  { %761 = vperm.xlu0 %3150, %v759_v35   ;;  %953 = vperm.xlu1 %3151, %v759_v35  }
  0x9b   :  { %3153 = vset.pattern.permute.xlu0 %v3387_v37  ;;  %3152 = vset.pattern.permute.xlu1 %v3388_v38 }
  0x9c   :  { %1348 = vperm.xlu0 %3153, %v759_v35   ;;  %1150 = vperm.xlu1 %3152, %v759_v35  }
  0xa0   :  { %3156 = vset.pattern.permute.xlu0 %v3389_v39  ;;  %3154 = vset.pattern.permute.xlu1 %v3390_v40 }
  0xa1   :  { %1942 = vperm.xlu0 %3156, %v759_v35   ;;  %1546 = vperm.xlu1 %3154, %v759_v35  }
  0xa5   :  { %3158 = vset.pattern.permute.xlu0 %v3391_v41  ;;  %3155 = vset.pattern.permute.xlu1 %v3392_v42 }
  0xa6   :  { %1744 = vperm.xlu1 %3155, %v759_v35  }
  0xaa   :  { %3157 = vset.pattern.permute.xlu1 %v3391_v41  ;;  %v2698_v41 = vld [vmem:[%s4158_s16] ss:$0 sm:$0xff] }
  0xab   :  { %2140 = vperm.xlu1 %3157, %v759_v35  }
  0xfd   :  { %v175_v44 = vpop.f32.mrb[0].mxu0 }
  0xfe   :  { %v176_v45 = vadd.f32 %v2681_v43, %v175_v44  ;;  %v2880_v46 = vpop.f32.mrb[1].mxu0 }
  0xff   :  { %v178_v47 = vpop.f32.mrb[2].mxu0 }
 0x100   :  { %3184 = vtanh.f32 %v176_v45  ;;  %v2881_v48 = vpop.f32.mrb[3].mxu0 }
 0x10a   :  { %v3185_v49 = vpop.eup %3184 }
 0x10b   :  { %v182_v52 = vpack.c.bf16 %v3185_v49, %v3185_v49 }
 0x10d   :  { %2887 = vmatmul.mubr.msk.bf16.vlgmr.msra.gmra.mrb[0].mxu1 %vm137_vm3, %v182_v52  ;;  %2895 = vmatmul.mubr.msk.bf16.vlgmr.msra.gmra.mrb[4].mxu0 %vm137_vm3, %v182_v52 }
 0x10e   :  { %2907 = vmatpush3.bf16.msra.mxu0 %v3165_v50  ;;  %2899 = vmatpush3.bf16.msra.mxu1 %v3166_v51 }
 0x10f   :  { %2908 = vmatprep.subr.bf16.mxu0 %v3383_v1  ;;  %2900 = vmatprep.subr.bf16.mxu1 %v3383_v1 }
 0x110   :  { %2902 = vmatprep.mubr.msk.bf16.mxu1 %vm3384_vm0, %v3383_v1  ;;  %2910 = vmatprep.mubr.msk.bf16.mxu0 %vm3384_vm0, %v3383_v1 }
 0x112   :  { %2909 = vmatpush3.bf16.msra.mxu0 %v3167_v53  ;;  %2901 = vmatpush3.bf16.msra.mxu1 %v3168_v54 }
 0x113   :  { %2922 = vmatprep.subr.bf16.mxu0 %v3383_v1  ;;  %2914 = vmatprep.subr.bf16.mxu1 %v3383_v1 }
 0x115   :  { %2903 = vmatmul.mubr.msk.bf16.vlgmr.msra.gmra.mrb[4].mxu1 %vm137_vm3, %v3545_v3  ;;  %2911 = vmatmul.mubr.msk.bf16.vlgmr.msra.gmra.mrb[8].mxu0 %vm137_vm3, %v3545_v3 }
 0x116   :  { %2923 = vmatpush3.bf16.msra.mxu0 %v3605_v55  ;;  %2915 = vmatpush3.bf16.msra.mxu1 %v3171_v56 }
 0x117   :  { %2924 = vmatprep.subr.bf16.mxu0 %v3383_v1  ;;  %2916 = vmatprep.subr.bf16.mxu1 %v3383_v1 }
 0x118   :  { %2918 = vmatprep.mubr.msk.bf16.mxu1 %vm3384_vm0, %v3383_v1  ;;  %2926 = vmatprep.mubr.msk.bf16.mxu0 %vm3384_vm0, %v3383_v1 }
 0x11a   :  { %2925 = vmatpush3.bf16.msra.mxu0 %v3620_v57  ;;  %2917 = vmatpush3.bf16.msra.mxu1 %v3173_v58 }
 0x11b   :  { %2930 = vmatprep.subr.bf16.mxu1 %v3383_v1  ;;  %2938 = vmatprep.subr.bf16.mxu0 %v3383_v1 }
 0x11d   :  { %2919 = vmatmul.mubr.msk.bf16.vlgmr.msra.gmra.mrb[8].mxu1 %vm137_vm3, %v3545_v3  ;;  %2927 = vmatmul.mubr.bf16.vlgmr.msra.gmra.mrb[12].mxu0 %v3385_v6 }
 0x11e   :  { %2931 = vmatpush3.bf16.msra.mxu1 %v3635_v59  ;;  %2934 = vmatprep.mubr.msk.bf16.mxu1 %vm3384_vm0, %v3383_v1 }
 0x11f   :  { %2932 = vmatprep.subr.bf16.mxu1 %v3383_v1  ;;  %2939 = vmatpush3.bf16.msra.mxu0 %v3642_v60 }
 0x120   :  { %2940 = vmatprep.subr.bf16.mxu0 %v3383_v1  ;;  %2942 = vmatprep.mubr.msk.bf16.mxu0 %vm3384_vm0, %v3383_v1 }
 0x122   :  { %2933 = vmatpush3.bf16.msra.mxu1 %v3651_v61 }
 0x123   :  { %2941 = vmatpush3.bf16.msra.mxu0 %v3660_v62  ;;  %2946 = vmatprep.subr.bf16.mxu1 %v3383_v1 }
 0x124   :  { %2954 = vmatprep.subr.bf16.mxu0 %v3383_v1 }
 0x125   :  { %2935 = vmatmul.mubr.bf16.vlgmr.msra.gmra.mrb[12].mxu1 %v3385_v6 }
 0x126   :  { %2943 = vmatmul.mubr.bf16.vlgmr.msra.gmra.mrb[16].mxu0 %v3385_v6  ;;  %2947 = vmatpush3.bf16.msra.mxu1 %v3605_v55 }
 0x127   :  { %2955 = vmatpush3.bf16.msra.mxu0 %v3635_v59  ;;  %2948 = vmatprep.subr.bf16.mxu1 %v3383_v1 }
 0x128   :  { %2956 = vmatprep.subr.bf16.mxu0 %v3383_v1  ;;  %2950 = vmatprep.mubr.msk.bf16.mxu1 %vm3384_vm0, %v3383_v1 }
 0x129   :  { %2958 = vmatprep.mubr.msk.bf16.mxu0 %vm3384_vm0, %v3383_v1 }
 0x12a   :  { %2949 = vmatpush3.bf16.msra.mxu1 %v3620_v57 }
 0x12b   :  { %2957 = vmatpush3.bf16.msra.mxu0 %v3651_v61  ;;  %2962 = vmatprep.subr.bf16.mxu1 %v3383_v1 }
 0x12c   :  { %2970 = vmatprep.subr.bf16.mxu0 %v3383_v1 }
 0x1e0   :  { %v243_v2 = vpop.f32.mrb[0].mxu1  ;;  %v306_v3 = vpop.f32.mrb[4].mxu0 }
 0x1e1   :  { %v244_v4 = vadd.f32 %v2685_v63, %v243_v2  ;;  %v307_v5 = vadd.f32 %v2689_v0, %v306_v3  ;;  %v2888_v6 = vpop.f32.mrb[1].mxu1  ;;  %v2896_v7 = vpop.f32.mrb[5].mxu0 }
 0x1e2   :  { %v246_v8 = vpop.f32.mrb[2].mxu1  ;;  %v309_v9 = vpop.f32.mrb[6].mxu0 }
 0x1e3   :  { %313 = vst.msk [vmem:[%s4167_s25] sm:$0x3] %vm312_vm5, %v244_v4  ;;  %314 = vst.msk [vmem:[%s4168_s26] sm:$0x3] %vm312_vm5, %v307_v5  ;;  %v315_v10 = vmul.f32 1.442695, %v307_v5 }
 0x1e4   :  { %v2889_v11 = vpop.f32.mrb[3].mxu1  ;;  %v2897_v12 = vpop.f32.mrb[7].mxu0  ;;  %v3721_v5 = vld [vmem:[%s4160_s18] ss:$0 sm:$0xff]  ;;  %vm2420_vm5 = vcmask 1045504  }
 0x1e5   :  { %3186 = vpow2.f32 %v315_v10  ;;  %v2702_v10 = vld [vmem:[%s4159_s17] ss:$0 sm:$0xff]  ;;  %s2662_s17 = sshll.u32 %s3394_s8, 4  ;;  %s2663_s17 = int_to_ptr.vmem [resolvable:$true] %s2662_s17 }
 0x1e6   :  { %s3359_s4 = scalar_lea.vmem %s2663_s17, 256  ;;  %p3364_p1 = scmp.lt.s32.totalorder %s2663_s17, %s2663_s17 }
 0x1e7   :  { %p3360_p0 = scmp.ne.s32.totalorder %s2663_s17, %s3359_s4  ;;  %p3365_p2 = scmp.lt.s32.totalorder %s3359_s4, %s3359_s4 }
 0x1e8   :  { %v449_v13 = vpop.f32.mrb[8].mxu0  ;;  %v385_v14 = vpop.f32.mrb[4].mxu1 }
 0x1e9   :  { %v2912_v15 = vpop.f32.mrb[9].mxu0  ;;  %v2904_v16 = vpop.f32.mrb[5].mxu1  ;;  %v3701_v23 = vadd.f32 %v2693_v17, %v385_v14  ;;  %v3712_v43 = vadd.f32 %v2698_v41, %v449_v13  ;;  %p3366_p3 = por %p3365_p2, %p3364_p1 }
 0x1ea   :  { %v452_v18 = vpop.f32.mrb[10].mxu0  ;;  %v388_v19 = vpop.f32.mrb[6].mxu1 }
 0x1eb   :  { %v2913_v20 = vpop.f32.mrb[11].mxu0  ;;  %v2905_v21 = vpop.f32.mrb[7].mxu1  ;;  %v3703_v28 = vadd.f32 %v2693_v17, %v388_v19  ;;  %v3714_v45 = vadd.f32 %v2698_v41, %v452_v18  ;;  %p3367_p4 = pnand %p3366_p3, %p3360_p0 }
 0x1ef   :  { %v3187_v24 = vpop.eup %3186 }
 0x1f0   :  { %v318_v25 = vmul.f32 %v3187_v24, %v317_v22  ;;  %v589_v26 = vpop.f32.mrb[12].mxu0  ;;  %v513_v27 = vpop.f32.mrb[8].mxu1 }
 0x1f1   :  { %v648_v29 = vrot.slane %v589_v26, 1  ;;  %v651_v30 = vadd.f32 %v589_v26, %v3701_v23  ;;  %v2928_v31 = vpop.f32.mrb[13].mxu0  ;;  %v2920_v33 = vpop.f32.mrb[9].mxu1  ;;  %v3727_v14 = vadd.f32 %v2702_v10, %v513_v27 }
 0x1f2   :  { %v592_v34 = vpop.f32.mrb[14].mxu0  ;;  %v516_v35 = vpop.f32.mrb[10].mxu1  ;;  %v3706_v36 = vadd.f32 %v318_v25, %v244_v4 }
 0x1f3   :  { %v652_v37 = vadd.f32 %v648_v29, %v3703_v28  ;;  %v2710_v38 = vmul.f32 -1.442695, %v651_v30  ;;  %v2929_v39 = vpop.f32.mrb[15].mxu0  ;;  %v2921_v40 = vpop.f32.mrb[11].mxu1  ;;  %v3729_v17 = vadd.f32 %v2702_v10, %v516_v35 }
 0x1f5   :  { %3188 = vpow2.f32 %v2710_v38  ;;  %v2711_v42 = vmul.f32 -1.442695, %v652_v37  ;;  %v762_v37 = vpop.permute.xlu0 %761 }
 0x1f6   :  { %vm763_vm6 = vcmp.eq.s32.totalorder %v762_v37, 1 }
 0x1f7   :  { %3190 = vpow2.f32 %v2711_v42 }
 0x1f8   :  { %v641_v44 = vpop.f32.mrb[12].mxu1 }
 0x1f9   :  { %v666_v46 = vrot.slane %v641_v44, 1  ;;  %v669_v47 = vadd.f32 %v641_v44, %v3712_v43  ;;  %v2936_v48 = vpop.f32.mrb[13].mxu1  ;;  %v735_v49 = vpop.f32.mrb[16].mxu0 }
 0x1fa   :  { %v644_v50 = vpop.f32.mrb[14].mxu1  ;;  %v2944_v51 = vpop.f32.mrb[17].mxu0  ;;  %v736_v7 = vadd.f32 %v3721_v5, %v735_v49 }
 0x1fb   :  { %v670_v52 = vadd.f32 %v666_v46, %v3714_v45  ;;  %v2712_v53 = vmul.f32 -1.442695, %v669_v47  ;;  %v2937_v54 = vpop.f32.mrb[15].mxu1  ;;  %v738_v56 = vpop.f32.mrb[18].mxu0 }
 0x1fc   :  { %v2945_v58 = vpop.f32.mrb[19].mxu0  ;;  %v742_v12 = vrot.slane %v736_v7, 1 }
 0x1fd   :  { %3192 = vpow2.f32 %v2712_v53  ;;  %v2713_v63 = vmul.f32 -1.442695, %v670_v52 }
 0x1ff   :  { %v3189_v0 = vpop.eup %3188  ;;  %3194 = vpow2.f32 %v2713_v63 }
 0x200   :  { %v659_v2 = vadd.f32 1.0, %v3189_v0 }
 0x201   :  { %v3191_v3 = vpop.eup %3190 }
 0x202   :  { %v660_v4 = vadd.f32 1.0, %v3191_v3  ;;  %3196 = vrcp.f32 %v659_v2 }
 0x204   :  { %3198 = vrcp.f32 %v660_v4 }
 0x207   :  { %v3193_v6 = vpop.eup %3192 }
 0x208   :  { %v677_v9 = vadd.f32 1.0, %v3193_v6 }
 0x209   :  { %v3195_v8 = vpop.eup %3194 }
 0x20a   :  { %v678_v11 = vadd.f32 1.0, %v3195_v8  ;;  %3200 = vrcp.f32 %v677_v9 }
 0x20c   :  { %v3197_v13 = vpop.eup %3196  ;;  %3202 = vrcp.f32 %v678_v11 }
 0x20d   :  { %v745_v15 = vmul.f32 %v3197_v13, %v736_v7 }
 0x20e   :  { %v3199_v16 = vpop.eup %3198 }
 0x20f   :  { %v746_v18 = vmul.f32 %v3199_v16, %v742_v12  ;;  %v747_v19 = vadd.f32 %v745_v15, %v3727_v14 }
 0x211   :  { %v748_v20 = vadd.f32 %v746_v18, %v3729_v17  ;;  %3204 = vtanh.f32 %v747_v19 }
 0x213   :  { %3206 = vtanh.f32 %v748_v20 }
 0x214   :  { %v3201_v21 = vpop.eup %3200 }
 0x215   :  { %v751_v24 = vsub.f32 1.0, %v3201_v21  ;;  %v755_v27 = vmul.f32 0.0, %v3201_v21 }
 0x216   :  { %v3203_v22 = vpop.eup %3202 }
 0x217   :  { %v752_v26 = vsub.f32 1.0, %v3203_v22  ;;  %v756_v31 = vmul.f32 0.0, %v3203_v22 }
 0x21b   :  { %v3205_v25 = vpop.eup %3204 }
 0x21c   :  { %v753_v29 = vmul.f32 %v3205_v25, %v751_v24 }
 0x21d   :  { %v3207_v30 = vpop.eup %3206 }
 0x21e   :  { %v754_v33 = vmul.f32 %v3207_v30, %v752_v26  ;;  %v757_v34 = vadd.f32 %v755_v27, %v753_v29 }
 0x220   :  { %v758_v35 = vadd.f32 %v756_v31, %v754_v33 }
 0x222   :  { %v766_v38 = vrot.slane %v758_v35, 7 }
 0x224   :  { %v767_v39 = vsel %vm122_vm2, %v766_v38, %v757_v34 }
 0x225   :  { %v3734_v40 = vsel %vm763_vm6, %v767_v39, 0.0  ;;  %vm2443_vm6 = vcmask 130048  }
 0x226   :  { %v770_v41 = vpack.c.bf16 %v3734_v40, %v3734_v40  ;;  %v945_v37 = vrot.slane %v3734_v40, 7 }
 0x228   :  { %2951 = vmatmul.mubr.msk.bf16.vlgmr.msra.gmra.mrb[16].mxu1 %vm137_vm3, %v770_v41  ;;  %2959 = vmatmul.mubr.msk.bf16.vlgmr.msra.gmra.mrb[20].mxu0 %vm137_vm3, %v770_v41 }
 0x229   :  { %2963 = vmatpush3.bf16.msra.mxu1 %v3642_v60  ;;  %2966 = vmatprep.mubr.msk.bf16.mxu1 %vm3384_vm0, %v3383_v1 }
 0x22a   :  { %2964 = vmatprep.subr.bf16.mxu1 %v3383_v1  ;;  %2971 = vmatpush3.bf16.msra.mxu0 %v3605_v55 }
 0x22b   :  { %2972 = vmatprep.subr.bf16.mxu0 %v3383_v1  ;;  %2974 = vmatprep.mubr.msk.bf16.mxu0 %vm3384_vm0, %v3383_v1 }
 0x22d   :  { %2965 = vmatpush3.bf16.msra.mxu1 %v3660_v62 }
 0x22e   :  { %2978 = vmatprep.subr.bf16.mxu1 %v3383_v1  ;;  %2973 = vmatpush3.bf16.msra.mxu0 %v3620_v57 }
 0x22f   :  { %2986 = vmatprep.subr.bf16.mxu0 %v3383_v1 }
 0x230   :  { %2967 = vmatmul.mubr.msk.bf16.vlgmr.msra.gmra.mrb[20].mxu1 %vm137_vm3, %v770_v41 }
 0x231   :  { %2979 = vmatpush3.bf16.msra.mxu1 %v3635_v59  ;;  %2982 = vmatprep.mubr.msk.bf16.mxu1 %vm3384_vm0, %v3383_v1 }
 0x232   :  { %2980 = vmatprep.subr.bf16.mxu1 %v3383_v1 }
 0x235   :  { %2981 = vmatpush3.bf16.msra.mxu1 %v3651_v61 }
 0x236   :  { %2994 = vmatprep.subr.bf16.mxu1 %v3383_v1 }
 0x2fb   :  { %v808_v42 = vpop.f32.mrb[16].mxu1  ;;  %v848_v44 = vpop.f32.mrb[20].mxu0 }
 0x2fc   :  { %v855_v46 = vrot.slane %v808_v42, 7  ;;  %v859_v47 = vadd.f32 %v808_v42, %v3703_v28  ;;  %v2952_v48 = vpop.f32.mrb[17].mxu1  ;;  %v2960_v49 = vpop.f32.mrb[21].mxu0  ;;  %v873_v50 = vrot.slane %v848_v44, 7  ;;  %v877_v63 = vadd.f32 %v848_v44, %v3714_v45 }
 0x2fd   :  { %v811_v51 = vpop.f32.mrb[18].mxu1  ;;  %v851_v52 = vpop.f32.mrb[22].mxu0 }
 0x2fe   :  { %v858_v53 = vadd.f32 %v855_v46, %v3701_v23  ;;  %v2720_v54 = vmul.f32 -1.442695, %v859_v47  ;;  %v2953_v56 = vpop.f32.mrb[19].mxu1  ;;  %v2961_v58 = vpop.f32.mrb[23].mxu0  ;;  %v876_v2 = vadd.f32 %v873_v50, %v3712_v43  ;;  %v2722_v3 = vmul.f32 -1.442695, %v877_v63 }
 0x2ff   :  { %v954_v49 = vpop.permute.xlu1 %953 }
 0x300   :  { %v2719_v0 = vmul.f32 -1.442695, %v858_v53  ;;  %3208 = vpow2.f32 %v2720_v54  ;;  %v2721_v7 = vmul.f32 -1.442695, %v876_v2  ;;  %vm955_vm7 = vcmp.eq.s32.totalorder %v954_v49, 1 }
 0x302   :  { %3210 = vpow2.f32 %v2719_v0 }
 0x303   :  { %v924_v4 = vpop.f32.mrb[20].mxu1  ;;  %3212 = vpow2.f32 %v2722_v3 }
 0x304   :  { %v2968_v6 = vpop.f32.mrb[21].mxu1  ;;  %3214 = vpow2.f32 %v2721_v7  ;;  %v925_v19 = vadd.f32 %v3721_v5, %v924_v4 }
 0x305   :  { %v927_v8 = vpop.f32.mrb[22].mxu1 }
 0x306   :  { %v2969_v9 = vpop.f32.mrb[23].mxu1  ;;  %v931_v22 = vrot.slane %v925_v19, 7 }
 0x30a   :  { %v3209_v10 = vpop.eup %3208 }
 0x30b   :  { %v867_v11 = vadd.f32 1.0, %v3209_v10 }
 0x30c   :  { %v3211_v12 = vpop.eup %3210 }
 0x30d   :  { %v866_v13 = vadd.f32 1.0, %v3211_v12  ;;  %3216 = vrcp.f32 %v867_v11  ;;  %v3213_v15 = vpop.eup %3212 }
 0x30e   :  { %v3215_v16 = vpop.eup %3214  ;;  %v885_v18 = vadd.f32 1.0, %v3213_v15 }
 0x30f   :  { %3218 = vrcp.f32 %v866_v13  ;;  %v884_v20 = vadd.f32 1.0, %v3215_v16 }
 0x310   :  { %3220 = vrcp.f32 %v885_v18 }
 0x311   :  { %3222 = vrcp.f32 %v884_v20 }
 0x317   :  { %v3217_v21 = vpop.eup %3216 }
 0x318   :  { %v935_v24 = vmul.f32 %v3217_v21, %v925_v19 }
 0x319   :  { %v3219_v25 = vpop.eup %3218 }
 0x31a   :  { %v934_v26 = vmul.f32 %v3219_v25, %v931_v22  ;;  %v937_v27 = vadd.f32 %v935_v24, %v3729_v17  ;;  %v3221_v30 = vpop.eup %3220 }
 0x31b   :  { %v3223_v31 = vpop.eup %3222  ;;  %v941_v33 = vsub.f32 1.0, %v3221_v30  ;;  %v949_v38 = vmul.f32 %v3221_v30, %v3734_v40 }
 0x31c   :  { %v936_v29 = vadd.f32 %v934_v26, %v3727_v14  ;;  %3224 = vtanh.f32 %v937_v27  ;;  %v940_v35 = vsub.f32 1.0, %v3223_v31  ;;  %v948_v42 = vmul.f32 %v3223_v31, %v945_v37 }
 0x31e   :  { %3226 = vtanh.f32 %v936_v29 }
 0x326   :  { %v3225_v34 = vpop.eup %3224 }
 0x327   :  { %v943_v39 = vmul.f32 %v3225_v34, %v941_v33 }
 0x328   :  { %v3227_v41 = vpop.eup %3226 }
 0x329   :  { %v942_v44 = vmul.f32 %v3227_v41, %v940_v35  ;;  %v951_v46 = vadd.f32 %v949_v38, %v943_v39 }
 0x32b   :  { %v950_v47 = vadd.f32 %v948_v42, %v942_v44 }
 0x32d   :  { %v958_v48 = vrot.slane %v950_v47, 1 }
 0x32f   :  { %v959_v50 = vsel %vm122_vm2, %v951_v46, %v958_v48  ;;  %v3393_v48 = vmov 1966171168  }
 0x330   :  { %v3770_v51 = vsel %vm955_vm7, %v959_v50, %v3734_v40  ;;  %v3772_v52 = vsel %vm955_vm7, %v959_v50, 0.0  ;;  %v2151_v49 = vunpack.c.l.s4 %v3393_v48  ;;  %vm2423_vm7 = vcmask 1046528  }
 0x331   :  { %v963_v53 = vpack.c.bf16 %v3770_v51, %v3770_v51 }
 0x332   :  { %v2152_v50 = vunpack.c.0.s8 %v2151_v49 }
 0x333   :  { %2975 = vmatmul.mubr.msk.bf16.vlgmr.msra.gmra.mrb[24].mxu0 %vm137_vm3, %v963_v53  ;;  %2983 = vmatmul.mubr.msk.bf16.vlgmr.msra.gmra.mrb[24].mxu1 %vm137_vm3, %v963_v53 }
 0x334   :  { %2987 = vmatpush3.bf16.msra.mxu0 %v3642_v60  ;;  %2990 = vmatprep.mubr.msk.bf16.mxu0 %vm3384_vm0, %v3383_v1 }
 0x335   :  { %2988 = vmatprep.subr.bf16.mxu0 %v3383_v1  ;;  %2995 = vmatpush3.bf16.msra.mxu1 %v3605_v55 }
 0x336   :  { %2996 = vmatprep.subr.bf16.mxu1 %v3383_v1  ;;  %2998 = vmatprep.mubr.msk.bf16.mxu1 %vm3384_vm0, %v3383_v1 }
 0x338   :  { %2989 = vmatpush3.bf16.msra.mxu0 %v3660_v62 }
 0x339   :  { %3002 = vmatprep.subr.bf16.mxu0 %v3383_v1  ;;  %2997 = vmatpush3.bf16.msra.mxu1 %v3620_v57 }
 0x33a   :  { %3010 = vmatprep.subr.bf16.mxu1 %v3383_v1 }
 0x33b   :  { %2991 = vmatmul.mubr.msk.bf16.vlgmr.msra.gmra.mrb[28].mxu0 %vm137_vm3, %v963_v53  ;;  %v2154_v53 = vshrl.u32 %v533_v32, 7 }
 0x33c   :  { %3003 = vmatpush3.bf16.msra.mxu0 %v3635_v59  ;;  %3006 = vmatprep.mubr.msk.bf16.mxu0 %vm3384_vm0, %v3383_v1 }
 0x33d   :  { %3004 = vmatprep.subr.bf16.mxu0 %v3383_v1 }
 0x340   :  { %3005 = vmatpush3.bf16.msra.mxu0 %v3651_v61 }
 0x341   :  { %3018 = vmatprep.subr.bf16.mxu0 %v3383_v1 }
 0x406   :  { %v1001_v54 = vpop.f32.mrb[24].mxu0  ;;  %v1041_v56 = vpop.f32.mrb[24].mxu1 }
 0x407   :  { %v1048_v58 = vrot.slane %v1001_v54, 6  ;;  %v1049_v63 = vrot.slane %v1001_v54, 7  ;;  %v2976_v0 = vpop.f32.mrb[25].mxu0  ;;  %v2984_v2 = vpop.f32.mrb[25].mxu1  ;;  %v1067_v3 = vrot.slane %v1041_v56, 6  ;;  %v1068_v9 = vrot.slane %v1041_v56, 7 }
 0x408   :  { %v1004_v4 = vpop.f32.mrb[26].mxu0  ;;  %v1044_v6 = vpop.f32.mrb[26].mxu1 }
 0x409   :  { %v1052_v7 = vadd.f32 %v1048_v58, %v3701_v23  ;;  %v1053_v8 = vadd.f32 %v1049_v63, %v3703_v28  ;;  %v2977_v10 = vpop.f32.mrb[27].mxu0  ;;  %v2985_v11 = vpop.f32.mrb[27].mxu1  ;;  %v1071_v15 = vadd.f32 %v1067_v3, %v3712_v43  ;;  %v1072_v16 = vadd.f32 %v1068_v9, %v3714_v45 }
 0x40a   :  { %v3805_v58 = vsub.s32 %v2152_v50, %v2154_v53  ;;  %v1141_v63 = vrot.slane %v3770_v51, 6  ;;  %v1142_v3 = vrot.slane %v3770_v51, 7 }
 0x40b   :  { %v2726_v12 = vmul.f32 -1.442695, %v1052_v7  ;;  %v2727_v13 = vmul.f32 -1.442695, %v1053_v8  ;;  %v2728_v20 = vmul.f32 -1.442695, %v1071_v15 }
 0x40c   :  { %v2729_v22 = vmul.f32 -1.442695, %v1072_v16  ;;  %v2181_v7 = vrot.slane %v3772_v52, %v3805_v58 }
 0x40d   :  { %3228 = vpow2.f32 %v2726_v12 }
 0x40e   :  { %3230 = vpow2.f32 %v2727_v13  ;;  %v1119_v18 = vpop.f32.mrb[28].mxu0  ;;  %v2182_v13 = vcombine.high %v2181_v7, %v2181_v7 }
 0x40f   :  { %v2992_v19 = vpop.f32.mrb[29].mxu0  ;;  %3232 = vpow2.f32 %v2728_v20  ;;  %v1120_v33 = vadd.f32 %v3721_v5, %v1119_v18  ;;  %v3811_v18 = vsub.s32 0, %v2154_v53  ;;  %v2156_v20 = vrot.slane %v3734_v40, %v3805_v58 }
 0x410   :  { %v1122_v21 = vpop.f32.mrb[30].mxu0  ;;  %3234 = vpow2.f32 %v2729_v22  ;;  %v1151_v19 = vpop.permute.xlu1 %1150  ;;  %v2196_v22 = vrot.slane %v2182_v13, %v3805_v58 }
 0x411   :  { %v2993_v24 = vpop.f32.mrb[31].mxu0  ;;  %v1126_v37 = vrot.slane %v1120_v33, 6  ;;  %v1127_v39 = vrot.slane %v1120_v33, 7  ;;  %v2189_v21 = vrot.slane %v2181_v7, %v3805_v58  ;;  %vm1152_vm8 = vcmp.eq.s32.totalorder %v1151_v19, 1 }
 0x412   :  { %v2342_v33 = vrot.slane %v2196_v22, %v3811_v18 }
 0x417   :  { %v3229_v25 = vpop.eup %3228 }
 0x418   :  { %v3231_v26 = vpop.eup %3230  ;;  %v1060_v27 = vadd.f32 1.0, %v3229_v25 }
 0x419   :  { %v1061_v29 = vadd.f32 1.0, %v3231_v26  ;;  %v3233_v30 = vpop.eup %3232 }
 0x41a   :  { %3236 = vrcp.f32 %v1060_v27  ;;  %v3235_v31 = vpop.eup %3234  ;;  %v1079_v34 = vadd.f32 1.0, %v3233_v30  ;;  %v2338_v30 = vrot.slane %v2189_v21, %v3811_v18 }
 0x41b   :  { %3238 = vrcp.f32 %v1061_v29  ;;  %v1080_v35 = vadd.f32 1.0, %v3235_v31  ;;  %v2157_v29 = vcombine.high %v2156_v20, %v2156_v20 }
 0x41c   :  { %3240 = vrcp.f32 %v1079_v34 }
 0x41d   :  { %3242 = vrcp.f32 %v1080_v35 }
 0x424   :  { %v3237_v38 = vpop.eup %3236 }
 0x425   :  { %v3239_v41 = vpop.eup %3238  ;;  %v1130_v42 = vmul.f32 %v3237_v38, %v1126_v37  ;;  %v2171_v37 = vrot.slane %v2157_v29, %v3805_v58 }
 0x426   :  { %v1131_v44 = vmul.f32 %v3239_v41, %v1127_v39  ;;  %v3241_v54 = vpop.eup %3240 }
 0x427   :  { %v1132_v46 = vadd.f32 %v1130_v42, %v3727_v14  ;;  %v3243_v56 = vpop.eup %3242  ;;  %v1136_v0 = vsub.f32 1.0, %v3241_v54  ;;  %v1145_v8 = vmul.f32 %v3241_v54, %v1141_v63  ;;  %v2407_v42 = vsel %vm2405_vm9, %v2171_v37, %v2342_v33 }
 0x428   :  { %v1133_v47 = vadd.f32 %v1131_v44, %v3729_v17  ;;  %v1137_v4 = vsub.f32 1.0, %v3243_v56  ;;  %v1146_v10 = vmul.f32 %v3243_v56, %v1142_v3 }
 0x429   :  { %3244 = vtanh.f32 %v1132_v46 }
 0x42a   :  { %3246 = vtanh.f32 %v1133_v47 }
 0x433   :  { %v3245_v2 = vpop.eup %3244 }
 0x434   :  { %v3247_v6 = vpop.eup %3246  ;;  %v1138_v9 = vmul.f32 %v3245_v2, %v1136_v0 }
 0x435   :  { %v1139_v11 = vmul.f32 %v3247_v6, %v1137_v4 }
 0x436   :  { %v1147_v32 = vadd.f32 %v1145_v8, %v1138_v9 }
 0x437   :  { %v1148_v12 = vadd.f32 %v1146_v10, %v1139_v11 }
 0x438   :  { %v1155_v15 = vrot.slane %v1147_v32, 2 }
 0x439   :  { %v1156_v16 = vrot.slane %v1148_v12, 1 }
 0x43b   :  { %v1157_v52 = vsel %vm122_vm2, %v1156_v16, %v1155_v15 }
 0x43c   :  { %v3819_v24 = vsel %vm1152_vm8, %v1157_v52, %v3770_v51  ;;  %v1160_v25 = vsel %vm1152_vm8, %v1157_v52, 0.0  ;;  %v2164_v51 = vrot.slane %v2156_v20, %v3805_v58 }
 0x43d   :  { %v1161_v26 = vpack.c.bf16 %v3819_v24, %v3819_v24  ;;  %v2204_v27 = vrot.slane %v1160_v25, %v3805_v58 }
 0x43e   :  { %v2406_v38 = vsel %vm2405_vm9, %v2164_v51, %v2338_v30 }
 0x43f   :  { %2999 = vmatmul.mubr.msk.bf16.vlgmr.msra.gmra.mrb[28].mxu1 %vm137_vm3, %v1161_v26  ;;  %v2205_v40 = vcombine.high %v2204_v27, %v2204_v27  ;;  %v2212_v31 = vrot.slane %v2204_v27, %v3805_v58  ;;  %3007 = vmatmul.mubr.msk.bf16.vlgmr.msra.gmra.mrb[32].mxu0 %vm137_vm3, %v1161_v26 }
 0x440   :  { %3011 = vmatpush3.bf16.msra.mxu1 %v3642_v60  ;;  %3014 = vmatprep.mubr.msk.bf16.mxu1 %vm3384_vm0, %v3383_v1 }
 0x441   :  { %v2219_v34 = vrot.slane %v2205_v40, %v3805_v58  ;;  %v2348_v35 = vrot.slane %v2212_v31, %v3811_v18  ;;  %3012 = vmatprep.subr.bf16.mxu1 %v3383_v1  ;;  %3019 = vmatpush3.bf16.msra.mxu0 %v3605_v55 }
 0x442   :  { %3020 = vmatprep.subr.bf16.mxu0 %v3383_v1  ;;  %3022 = vmatprep.mubr.msk.bf16.mxu0 %vm3384_vm0, %v3383_v1 }
 0x443   :  { %v2352_v39 = vrot.slane %v2219_v34, %v3811_v18  ;;  %v3843_v41 = vsel %vm2408_vm10, %v2406_v38, %v2348_v35 }
 0x444   :  { %3013 = vmatpush3.bf16.msra.mxu1 %v3660_v62 }
 0x445   :  { %3026 = vmatprep.subr.bf16.mxu1 %v3383_v1  ;;  %3021 = vmatpush3.bf16.msra.mxu0 %v3620_v57  ;;  %v3849_v44 = vsel %vm2408_vm10, %v2407_v42, %v2352_v39  ;;  %v1339_v42 = vrot.slane %v3819_v24, 5 }
 0x446   :  { %3034 = vmatprep.subr.bf16.mxu0 %v3383_v1 }
 0x447   :  { %3015 = vmatmul.mubr.msk.bf16.vlgmr.msra.gmra.mrb[32].mxu1 %vm137_vm3, %v1161_v26 }
 0x448   :  { %3027 = vmatpush3.bf16.msra.mxu1 %v3635_v59  ;;  %3030 = vmatprep.mubr.msk.bf16.mxu1 %vm3384_vm0, %v3383_v1 }
 0x449   :  { %3028 = vmatprep.subr.bf16.mxu1 %v3383_v1 }
 0x44c   :  { %3029 = vmatpush3.bf16.msra.mxu1 %v3651_v61 }
 0x44d   :  { %3042 = vmatprep.subr.bf16.mxu1 %v3383_v1 }
 0x512   :  { %v1199_v46 = vpop.f32.mrb[28].mxu1  ;;  %v1239_v47 = vpop.f32.mrb[32].mxu0 }
 0x513   :  { %v1246_v48 = vrot.slane %v1199_v46, 5  ;;  %v1247_v49 = vrot.slane %v1199_v46, 6  ;;  %v3000_v50 = vpop.f32.mrb[29].mxu1  ;;  %v3008_v53 = vpop.f32.mrb[33].mxu0  ;;  %v1265_v54 = vrot.slane %v1239_v47, 5  ;;  %v1266_v3 = vrot.slane %v1239_v47, 6 }
 0x514   :  { %v1202_v56 = vpop.f32.mrb[30].mxu1  ;;  %v1242_v63 = vpop.f32.mrb[34].mxu0 }
 0x515   :  { %v1250_v0 = vadd.f32 %v1246_v48, %v3701_v23  ;;  %v1251_v2 = vadd.f32 %v1247_v49, %v3703_v28  ;;  %v3001_v4 = vpop.f32.mrb[31].mxu1  ;;  %v3009_v6 = vpop.f32.mrb[35].mxu0  ;;  %v1269_v9 = vadd.f32 %v1265_v54, %v3712_v43  ;;  %v1270_v10 = vadd.f32 %v1266_v3, %v3714_v45 }
 0x516   :  { %v1340_v48 = vrot.slane %v3819_v24, 6  ;;  %v1349_v6 = vpop.permute.xlu0 %1348 }
 0x517   :  { %v2733_v7 = vmul.f32 -1.442695, %v1250_v0  ;;  %v2734_v8 = vmul.f32 -1.442695, %v1251_v2  ;;  %v2735_v12 = vmul.f32 -1.442695, %v1269_v9 }
 0x518   :  { %v2736_v15 = vmul.f32 -1.442695, %v1270_v10  ;;  %vm1350_vm11 = vcmp.eq.s32.totalorder %v1349_v6, 1 }
 0x519   :  { %3248 = vpow2.f32 %v2733_v7 }
 0x51a   :  { %3250 = vpow2.f32 %v2734_v8  ;;  %v1317_v11 = vpop.f32.mrb[32].mxu1 }
 0x51b   :  { %v3016_v32 = vpop.f32.mrb[33].mxu1  ;;  %3252 = vpow2.f32 %v2735_v12  ;;  %v1318_v26 = vadd.f32 %v3721_v5, %v1317_v11 }
 0x51c   :  { %v1320_v13 = vpop.f32.mrb[34].mxu1  ;;  %3254 = vpow2.f32 %v2736_v15 }
 0x51d   :  { %v3017_v16 = vpop.f32.mrb[35].mxu1  ;;  %v1324_v30 = vrot.slane %v1318_v26, 5  ;;  %v1325_v31 = vrot.slane %v1318_v26, 6 }
 0x523   :  { %v3249_v19 = vpop.eup %3248 }
 0x524   :  { %v3251_v20 = vpop.eup %3250  ;;  %v1258_v21 = vadd.f32 1.0, %v3249_v19 }
 0x525   :  { %v1259_v52 = vadd.f32 1.0, %v3251_v20  ;;  %v3253_v22 = vpop.eup %3252 }
 0x526   :  { %3256 = vrcp.f32 %v1258_v21  ;;  %v3255_v25 = vpop.eup %3254  ;;  %v1277_v27 = vadd.f32 1.0, %v3253_v22 }
 0x527   :  { %3258 = vrcp.f32 %v1259_v52  ;;  %v1278_v29 = vadd.f32 1.0, %v3255_v25 }
 0x528   :  { %3260 = vrcp.f32 %v1277_v27 }
 0x529   :  { %3262 = vrcp.f32 %v1278_v29 }
 0x530   :  { %v3257_v40 = vpop.eup %3256 }
 0x531   :  { %v3259_v51 = vpop.eup %3258  ;;  %v1328_v33 = vmul.f32 %v3257_v40, %v1324_v30 }
 0x532   :  { %v1329_v34 = vmul.f32 %v3259_v51, %v1325_v31  ;;  %v3261_v38 = vpop.eup %3260 }
 0x533   :  { %v1330_v35 = vadd.f32 %v1328_v33, %v3727_v14  ;;  %v3263_v39 = vpop.eup %3262  ;;  %v1334_v46 = vsub.f32 1.0, %v3261_v38  ;;  %v1343_v53 = vmul.f32 %v3261_v38, %v1339_v42 }
 0x534   :  { %v1331_v37 = vadd.f32 %v1329_v34, %v3729_v17  ;;  %v1335_v49 = vsub.f32 1.0, %v3263_v39  ;;  %v1344_v56 = vmul.f32 %v3263_v39, %v1340_v48 }
 0x535   :  { %3264 = vtanh.f32 %v1330_v35 }
 0x536   :  { %3266 = vtanh.f32 %v1331_v37 }
 0x53f   :  { %v3265_v47 = vpop.eup %3264 }
 0x540   :  { %v3267_v50 = vpop.eup %3266  ;;  %v1336_v54 = vmul.f32 %v3265_v47, %v1334_v46 }
 0x541   :  { %v1337_v63 = vmul.f32 %v3267_v50, %v1335_v49 }
 0x542   :  { %v1345_v0 = vadd.f32 %v1343_v53, %v1336_v54 }
 0x543   :  { %v1346_v2 = vadd.f32 %v1344_v56, %v1337_v63 }
 0x544   :  { %v1353_v3 = vrot.slane %v1345_v0, 3 }
 0x545   :  { %v1354_v4 = vrot.slane %v1346_v2, 2 }
 0x547   :  { %v1355_v7 = vsel %vm122_vm2, %v1354_v4, %v1353_v3 }
 0x548   :  { %v3870_v8 = vsel %vm1350_vm11, %v1355_v7, %v3819_v24  ;;  %v1358_v9 = vsel %vm1350_vm11, %v1355_v7, 0.0 }
 0x549   :  { %v1359_v10 = vpack.c.bf16 %v3870_v8, %v3870_v8  ;;  %v2227_v11 = vrot.slane %v1358_v9, %v3805_v58 }
 0x54b   :  { %3023 = vmatmul.mubr.msk.bf16.vlgmr.msra.gmra.mrb[36].mxu0 %vm137_vm3, %v1359_v10  ;;  %v2228_v32 = vcombine.high %v2227_v11, %v2227_v11  ;;  %v2235_v12 = vrot.slane %v2227_v11, %v3805_v58  ;;  %3031 = vmatmul.mubr.msk.bf16.vlgmr.msra.gmra.mrb[36].mxu1 %vm137_vm3, %v1359_v10 }
 0x54c   :  { %3035 = vmatpush3.bf16.msra.mxu0 %v3642_v60  ;;  %3038 = vmatprep.mubr.msk.bf16.mxu0 %vm3384_vm0, %v3383_v1 }
 0x54d   :  { %v2242_v24 = vrot.slane %v2228_v32, %v3805_v58  ;;  %v2358_v13 = vrot.slane %v2235_v12, %v3811_v18  ;;  %3036 = vmatprep.subr.bf16.mxu0 %v3383_v1  ;;  %3043 = vmatpush3.bf16.msra.mxu1 %v3605_v55  ;;  %v1538_v12 = vrot.slane %v3870_v8, 5 }
 0x54e   :  { %3044 = vmatprep.subr.bf16.mxu1 %v3383_v1  ;;  %3046 = vmatprep.mubr.msk.bf16.mxu1 %vm3384_vm0, %v3383_v1 }
 0x54f   :  { %v2362_v15 = vrot.slane %v2242_v24, %v3811_v18  ;;  %v3890_v60 = vsel %vm2411_vm12, %v3843_v41, %v2358_v13 }
 0x550   :  { %3037 = vmatpush3.bf16.msra.mxu0 %v3660_v62 }
 0x551   :  { %3050 = vmatprep.subr.bf16.mxu0 %v3383_v1  ;;  %3045 = vmatpush3.bf16.msra.mxu1 %v3620_v57  ;;  %v3896_v16 = vsel %vm2411_vm12, %v3849_v44, %v2362_v15 }
 0x552   :  { %3058 = vmatprep.subr.bf16.mxu1 %v3383_v1 }
 0x553   :  { %3039 = vmatmul.mubr.msk.bf16.vlgmr.msra.gmra.mrb[40].mxu0 %vm137_vm3, %v1359_v10  ;;  %v1537_v10 = vrot.slane %v3870_v8, 4 }
 0x554   :  { %3051 = vmatpush3.bf16.msra.mxu0 %v3635_v59  ;;  %3054 = vmatprep.mubr.msk.bf16.mxu0 %vm3384_vm0, %v3383_v1 }
 0x555   :  { %3052 = vmatprep.subr.bf16.mxu0 %v3383_v1 }
 0x558   :  { %3053 = vmatpush3.bf16.msra.mxu0 %v3651_v61 }
 0x559   :  { %3066 = vmatprep.subr.bf16.mxu0 %v3383_v1 }
 0x61e   :  { %v1397_v55 = vpop.f32.mrb[36].mxu0  ;;  %v1437_v57 = vpop.f32.mrb[36].mxu1 }
 0x61f   :  { %v1444_v62 = vrot.slane %v1397_v55, 4  ;;  %v1445_v41 = vrot.slane %v1397_v55, 5  ;;  %v3024_v44 = vpop.f32.mrb[37].mxu0  ;;  %v3032_v19 = vpop.f32.mrb[37].mxu1  ;;  %v1463_v20 = vrot.slane %v1437_v57, 4  ;;  %v1464_v25 = vrot.slane %v1437_v57, 5 }
 0x620   :  { %v1400_v21 = vpop.f32.mrb[38].mxu0  ;;  %v1440_v52 = vpop.f32.mrb[38].mxu1 }
 0x621   :  { %v1448_v59 = vadd.f32 %v1444_v62, %v3701_v23  ;;  %v1449_v22 = vadd.f32 %v1445_v41, %v3703_v28  ;;  %v3025_v26 = vpop.f32.mrb[39].mxu0  ;;  %v3033_v27 = vpop.f32.mrb[39].mxu1  ;;  %v1467_v30 = vadd.f32 %v1463_v20, %v3712_v43  ;;  %v1468_v40 = vadd.f32 %v1464_v25, %v3714_v45 }
 0x622   :  { %v1547_v21 = vpop.permute.xlu1 %1546 }
 0x623   :  { %v2740_v29 = vmul.f32 -1.442695, %v1448_v59  ;;  %v2741_v61 = vmul.f32 -1.442695, %v1449_v22  ;;  %v2742_v33 = vmul.f32 -1.442695, %v1467_v30 }
 0x624   :  { %v2743_v35 = vmul.f32 -1.442695, %v1468_v40  ;;  %vm1548_vm13 = vcmp.eq.s32.totalorder %v1547_v21, 1  ;;  %v3938_v30 = vld [vmem:[%s4154_s12] sm:$0xff]  }
 0x625   :  { %3268 = vpow2.f32 %v2740_v29 }
 0x626   :  { %3270 = vpow2.f32 %v2741_v61  ;;  %v1515_v31 = vpop.f32.mrb[40].mxu0  ;;  %v3928_v61 = vld [vmem:[%s4156_s14] sm:$0xff]  }
 0x627   :  { %v3040_v51 = vpop.f32.mrb[41].mxu0  ;;  %3272 = vpow2.f32 %v2742_v33  ;;  %v1516_v49 = vadd.f32 %v3721_v5, %v1515_v31  ;;  %v3952_v33 = vld [vmem:[%s4156_s14 + $0x8] sm:$0xff]  }
 0x628   :  { %v1518_v34 = vpop.f32.mrb[42].mxu0  ;;  %3274 = vpow2.f32 %v2743_v35 }
 0x629   :  { %v3041_v37 = vpop.f32.mrb[43].mxu0  ;;  %v1522_v54 = vrot.slane %v1516_v49, 4  ;;  %v1523_v63 = vrot.slane %v1516_v49, 5  ;;  %v3959_v34 = vld [vmem:[%s4154_s12 + $0x8] sm:$0xff]  }
 0x62f   :  { %v3269_v38 = vpop.eup %3268 }
 0x630   :  { %v3271_v39 = vpop.eup %3270  ;;  %v1456_v42 = vadd.f32 1.0, %v3269_v38 }
 0x631   :  { %v1457_v46 = vadd.f32 1.0, %v3271_v39  ;;  %v3273_v47 = vpop.eup %3272 }
 0x632   :  { %3276 = vrcp.f32 %v1456_v42  ;;  %v3275_v48 = vpop.eup %3274  ;;  %v1475_v50 = vadd.f32 1.0, %v3273_v47 }
 0x633   :  { %3278 = vrcp.f32 %v1457_v46  ;;  %v1476_v53 = vadd.f32 1.0, %v3275_v48 }
 0x634   :  { %3280 = vrcp.f32 %v1475_v50 }
 0x635   :  { %3282 = vrcp.f32 %v1476_v53 }
 0x63c   :  { %v3277_v56 = vpop.eup %3276 }
 0x63d   :  { %v3279_v0 = vpop.eup %3278  ;;  %v1526_v2 = vmul.f32 %v3277_v56, %v1522_v54 }
 0x63e   :  { %v1527_v3 = vmul.f32 %v3279_v0, %v1523_v63  ;;  %v3281_v7 = vpop.eup %3280 }
 0x63f   :  { %v1528_v4 = vadd.f32 %v1526_v2, %v3727_v14  ;;  %v3283_v9 = vpop.eup %3282  ;;  %v1532_v11 = vsub.f32 1.0, %v3281_v7  ;;  %v1541_v15 = vmul.f32 %v3281_v7, %v1537_v10 }
 0x640   :  { %v1529_v6 = vadd.f32 %v1527_v3, %v3729_v17  ;;  %v1533_v24 = vsub.f32 1.0, %v3283_v9  ;;  %v1542_v57 = vmul.f32 %v3283_v9, %v1538_v12 }
 0x641   :  { %3284 = vtanh.f32 %v1528_v4 }
 0x642   :  { %3286 = vtanh.f32 %v1529_v6 }
 0x64b   :  { %v3285_v32 = vpop.eup %3284 }
 0x64c   :  { %v3287_v13 = vpop.eup %3286  ;;  %v1534_v55 = vmul.f32 %v3285_v32, %v1532_v11 }
 0x64d   :  { %v1535_v62 = vmul.f32 %v3287_v13, %v1533_v24 }
 0x64e   :  { %v1543_v41 = vadd.f32 %v1541_v15, %v1534_v55 }
 0x64f   :  { %v1544_v44 = vadd.f32 %v1542_v57, %v1535_v62 }
 0x650   :  { %v1551_v19 = vrot.slane %v1543_v41, 4 }
 0x651   :  { %v1552_v20 = vrot.slane %v1544_v44, 3 }
 0x653   :  { %v1553_v52 = vsel %vm122_vm2, %v1552_v20, %v1551_v19 }
 0x654   :  { %v3917_v59 = vsel %vm1548_vm13, %v1553_v52, %v3870_v8  ;;  %v1556_v22 = vsel %vm1548_vm13, %v1553_v52, 0.0 }
 0x655   :  { %v1557_v25 = vpack.c.bf16 %v3917_v59, %v3917_v59  ;;  %v2250_v26 = vrot.slane %v1556_v22, %v3805_v58 }
 0x657   :  { %3047 = vmatmul.mubr.msk.bf16.vlgmr.msra.gmra.mrb[40].mxu1 %vm137_vm3, %v1557_v25  ;;  %v2251_v27 = vcombine.high %v2250_v26, %v2250_v26  ;;  %v2258_v29 = vrot.slane %v2250_v26, %v3805_v58  ;;  %3055 = vmatmul.mubr.msk.bf16.vlgmr.msra.gmra.mrb[44].mxu0 %vm137_vm3, %v1557_v25 }
 0x658   :  { %3059 = vmatpush3.bf16.msra.mxu1 %v3928_v61  ;;  %3062 = vmatprep.mubr.msk.bf16.mxu1 %vm3384_vm0, %v3383_v1 }
 0x659   :  { %v2265_v8 = vrot.slane %v2251_v27, %v3805_v58  ;;  %3060 = vmatprep.subr.bf16.mxu1 %v3383_v1  ;;  %3067 = vmatpush3.bf16.msra.mxu0 %v3938_v30  ;;  %v2368_v40 = vrot.slane %v2258_v29, %v3811_v18 }
 0x65a   :  { %3068 = vmatprep.subr.bf16.mxu0 %v3383_v1  ;;  %3070 = vmatprep.mubr.msk.bf16.mxu0 %vm3384_vm0, %v3383_v1 }
 0x65b   :  { %v2372_v31 = vrot.slane %v2265_v8, %v3811_v18  ;;  %v3947_v51 = vsel %vm2414_vm14, %v3890_v60, %v2368_v40  ;;  %v3970_v60 = vld [vmem:[%s4155_s13] sm:$0xff]  }
 0x65c   :  { %3061 = vmatpush3.bf16.msra.mxu1 %v3952_v33 }
 0x65d   :  { %3074 = vmatprep.subr.bf16.mxu1 %v3383_v1  ;;  %3069 = vmatpush3.bf16.msra.mxu0 %v3959_v34  ;;  %v3963_v35 = vsel %vm2414_vm14, %v3896_v16, %v2372_v31  ;;  %v3979_v16 = vld [vmem:[%s4155_s13 + $0x8] sm:$0xff]  }
 0x65e   :  { %3082 = vmatprep.subr.bf16.mxu0 %v3383_v1 }
 0x65f   :  { %3063 = vmatmul.mubr.msk.bf16.vlgmr.msra.gmra.mrb[44].mxu1 %vm137_vm3, %v1557_v25 }
 0x660   :  { %3075 = vmatpush3.bf16.msra.mxu1 %v3970_v60  ;;  %3078 = vmatprep.mubr.msk.bf16.mxu1 %vm3384_vm0, %v3383_v1 }
 0x661   :  { %3076 = vmatprep.subr.bf16.mxu1 %v3383_v1 }
 0x664   :  { %3077 = vmatpush3.bf16.msra.mxu1 %v3979_v16 }
 0x665   :  { %3090 = vmatprep.subr.bf16.mxu1 %v3383_v1 }
 0x72a   :  { %v1595_v37 = vpop.f32.mrb[40].mxu1  ;;  %v1635_v38 = vpop.f32.mrb[44].mxu0 }
 0x72b   :  { %v1642_v39 = vrot.slane %v1595_v37, 3  ;;  %v1643_v42 = vrot.slane %v1595_v37, 4  ;;  %v3048_v46 = vpop.f32.mrb[41].mxu1  ;;  %v3056_v47 = vpop.f32.mrb[45].mxu0  ;;  %v1661_v48 = vrot.slane %v1635_v38, 3  ;;  %v1662_v56 = vrot.slane %v1635_v38, 4 }
 0x72c   :  { %v1598_v49 = vpop.f32.mrb[42].mxu1  ;;  %v1638_v50 = vpop.f32.mrb[46].mxu0  ;;  %v1736_v38 = vrot.slane %v3917_v59, 4 }
 0x72d   :  { %v1646_v53 = vadd.f32 %v1642_v39, %v3701_v23  ;;  %v1647_v54 = vadd.f32 %v1643_v42, %v3703_v28  ;;  %v3049_v63 = vpop.f32.mrb[43].mxu1  ;;  %v3057_v0 = vpop.f32.mrb[47].mxu0  ;;  %v1665_v4 = vadd.f32 %v1661_v48, %v3712_v43  ;;  %v1666_v6 = vadd.f32 %v1662_v56, %v3714_v45 }
 0x72e   :  { %v1745_v63 = vpop.permute.xlu1 %1744 }
 0x72f   :  { %v2747_v2 = vmul.f32 -1.442695, %v1646_v53  ;;  %v2748_v3 = vmul.f32 -1.442695, %v1647_v54  ;;  %v2749_v10 = vmul.f32 -1.442695, %v1665_v4 }
 0x730   :  { %v2750_v32 = vmul.f32 -1.442695, %v1666_v6  ;;  %vm1746_vm15 = vcmp.eq.s32.totalorder %v1745_v63, 1 }
 0x731   :  { %3288 = vpow2.f32 %v2747_v2 }
 0x732   :  { %3290 = vpow2.f32 %v2748_v3  ;;  %v1713_v7 = vpop.f32.mrb[44].mxu1 }
 0x733   :  { %v3064_v9 = vpop.f32.mrb[45].mxu1  ;;  %3292 = vpow2.f32 %v2749_v10  ;;  %v1714_v41 = vadd.f32 %v3721_v5, %v1713_v7  ;;  %v1735_v5 = vrot.slane %v3917_v59, 3 }
 0x734   :  { %v1716_v11 = vpop.f32.mrb[46].mxu1  ;;  %3294 = vpow2.f32 %v2750_v32 }
 0x735   :  { %v3065_v12 = vpop.f32.mrb[47].mxu1  ;;  %v1720_v20 = vrot.slane %v1714_v41, 3  ;;  %v1721_v52 = vrot.slane %v1714_v41, 4 }
 0x73b   :  { %v3289_v24 = vpop.eup %3288 }
 0x73c   :  { %v3291_v13 = vpop.eup %3290  ;;  %v1654_v15 = vadd.f32 1.0, %v3289_v24 }
 0x73d   :  { %v1655_v55 = vadd.f32 1.0, %v3291_v13  ;;  %v3293_v57 = vpop.eup %3292 }
 0x73e   :  { %3296 = vrcp.f32 %v1654_v15  ;;  %v3295_v62 = vpop.eup %3294  ;;  %v1673_v44 = vadd.f32 1.0, %v3293_v57 }
 0x73f   :  { %3298 = vrcp.f32 %v1655_v55  ;;  %v1674_v19 = vadd.f32 1.0, %v3295_v62 }
 0x740   :  { %3300 = vrcp.f32 %v1673_v44 }
 0x741   :  { %3302 = vrcp.f32 %v1674_v19 }
 0x748   :  { %v3297_v21 = vpop.eup %3296 }
 0x749   :  { %v3299_v22 = vpop.eup %3298  ;;  %v1724_v25 = vmul.f32 %v3297_v21, %v1720_v20 }
 0x74a   :  { %v1725_v26 = vmul.f32 %v3299_v22, %v1721_v52  ;;  %v3301_v8 = vpop.eup %3300 }
 0x74b   :  { %v1726_v27 = vadd.f32 %v1724_v25, %v3727_v14  ;;  %v3303_v40 = vpop.eup %3302  ;;  %v1730_v31 = vsub.f32 1.0, %v3301_v8  ;;  %v1739_v46 = vmul.f32 %v3301_v8, %v1735_v5 }
 0x74c   :  { %v1727_v29 = vadd.f32 %v1725_v26, %v3729_v17  ;;  %v1731_v39 = vsub.f32 1.0, %v3303_v40  ;;  %v1740_v48 = vmul.f32 %v3303_v40, %v1736_v38 }
 0x74d   :  { %3304 = vtanh.f32 %v1726_v27 }
 0x74e   :  { %3306 = vtanh.f32 %v1727_v29 }
 0x757   :  { %v3305_v37 = vpop.eup %3304 }
 0x758   :  { %v3307_v42 = vpop.eup %3306  ;;  %v1732_v47 = vmul.f32 %v3305_v37, %v1730_v31 }
 0x759   :  { %v1733_v49 = vmul.f32 %v3307_v42, %v1731_v39  ;;  %v4037_v42 = vld [vmem:[%s4160_s18] ss:$0 sm:$0xff] }
 0x75a   :  { %v1741_v50 = vadd.f32 %v1739_v46, %v1732_v47 }
 0x75b   :  { %v1742_v53 = vadd.f32 %v1740_v48, %v1733_v49 }
 0x75c   :  { %v1749_v54 = vrot.slane %v1741_v50, 5 }
 0x75d   :  { %v1750_v56 = vrot.slane %v1742_v53, 4 }
 0x75f   :  { %v1751_v0 = vsel %vm122_vm2, %v1750_v56, %v1749_v54 }
 0x760   :  { %v3994_v2 = vsel %vm1746_vm15, %v1751_v0, %v3917_v59  ;;  %v1754_v3 = vsel %vm1746_vm15, %v1751_v0, 0.0 }
 0x761   :  { %v1755_v4 = vpack.c.bf16 %v3994_v2, %v3994_v2  ;;  %v2273_v6 = vrot.slane %v1754_v3, %v3805_v58 }
 0x763   :  { %3071 = vmatmul.mubr.msk.bf16.vlgmr.msra.gmra.mrb[48].mxu0 %vm137_vm3, %v1755_v4  ;;  %v2274_v7 = vcombine.high %v2273_v6, %v2273_v6  ;;  %v2281_v9 = vrot.slane %v2273_v6, %v3805_v58  ;;  %3079 = vmatmul.mubr.msk.bf16.vlgmr.msra.gmra.mrb[48].mxu1 %vm137_vm3, %v1755_v4 }
 0x764   :  { %3083 = vmatpush3.bf16.msra.mxu0 %v3928_v61  ;;  %3086 = vmatprep.mubr.msk.bf16.mxu0 %vm3384_vm0, %v3383_v1 }
 0x765   :  { %3084 = vmatprep.subr.bf16.mxu0 %v3383_v1  ;;  %3091 = vmatpush3.bf16.msra.mxu1 %v3938_v30  ;;  %v2288_v59 = vrot.slane %v2274_v7, %v3805_v58  ;;  %v2378_v10 = vrot.slane %v2281_v9, %v3811_v18  ;;  %v1933_v7 = vrot.slane %v3994_v2, 2 }
 0x766   :  { %3092 = vmatprep.subr.bf16.mxu1 %v3383_v1  ;;  %3094 = vmatprep.mubr.msk.bf16.mxu1 %vm3384_vm0, %v3383_v1 }
 0x767   :  { %v2382_v11 = vrot.slane %v2288_v59, %v3811_v18  ;;  %v4014_v32 = vsel %vm2417_vm1, %v3947_v51, %v2378_v10  ;;  %v1934_v10 = vrot.slane %v3994_v2, 3 }
 0x768   :  { %3085 = vmatpush3.bf16.msra.mxu0 %v3952_v33 }
 0x769   :  { %3098 = vmatprep.subr.bf16.mxu0 %v3383_v1  ;;  %3093 = vmatpush3.bf16.msra.mxu1 %v3959_v34  ;;  %v4020_v30 = vsel %vm2417_vm1, %v3963_v35, %v2382_v11 }
 0x76a   :  { %3106 = vmatprep.subr.bf16.mxu1 %v3383_v1 }
 0x76b   :  { %3087 = vmatmul.mubr.msk.bf16.vlgmr.msra.gmra.mrb[52].mxu0 %vm137_vm3, %v1755_v4 }
 0x76c   :  { %3099 = vmatpush3.bf16.msra.mxu0 %v3970_v60  ;;  %3102 = vmatprep.mubr.msk.bf16.mxu0 %vm3384_vm0, %v3383_v1 }
 0x76d   :  { %3100 = vmatprep.subr.bf16.mxu0 %v3383_v1 }
 0x770   :  { %3101 = vmatpush3.bf16.msra.mxu0 %v3979_v16 }
 0x771   :  { %3114 = vmatprep.subr.bf16.mxu0 %v3383_v1 }
 0x836   :  { %v1793_v51 = vpop.f32.mrb[48].mxu0  ;;  %v1833_v34 = vpop.f32.mrb[48].mxu1 }
 0x837   :  { %v1840_v12 = vrot.slane %v1793_v51, 2  ;;  %v1841_v35 = vrot.slane %v1793_v51, 3  ;;  %v3072_v24 = vpop.f32.mrb[49].mxu0  ;;  %v3080_v13 = vpop.f32.mrb[49].mxu1  ;;  %v1859_v15 = vrot.slane %v1833_v34, 2  ;;  %v1860_v41 = vrot.slane %v1833_v34, 3 }
 0x838   :  { %v1796_v55 = vpop.f32.mrb[50].mxu0  ;;  %v1836_v57 = vpop.f32.mrb[50].mxu1 }
 0x839   :  { %v1844_v60 = vadd.f32 %v1840_v12, %v3701_v23  ;;  %v1845_v62 = vadd.f32 %v1841_v35, %v3703_v28  ;;  %v3073_v44 = vpop.f32.mrb[51].mxu0  ;;  %v3081_v19 = vpop.f32.mrb[51].mxu1  ;;  %v1863_v21 = vadd.f32 %v1859_v15, %v3712_v43  ;;  %v1864_v52 = vadd.f32 %v1860_v41, %v3714_v45 }
 0x83a   :  { %v1943_v55 = vpop.permute.xlu0 %1942  ;;  %v3178_v19 = vld [vmem:[%s4162_s20] sm:$0xff]  }
 0x83b   :  { %v2754_v20 = vmul.f32 -1.442695, %v1844_v60  ;;  %v2755_v16 = vmul.f32 -1.442695, %v1845_v62  ;;  %v2756_v26 = vmul.f32 -1.442695, %v1863_v21 }
 0x83c   :  { %v2757_v29 = vmul.f32 -1.442695, %v1864_v52  ;;  %vm1944_vm4 = vcmp.eq.s32.totalorder %v1943_v55, 1 }
 0x83d   :  { %3308 = vpow2.f32 %v2754_v20 }
 0x83e   :  { %3310 = vpow2.f32 %v2755_v16  ;;  %v1911_v22 = vpop.f32.mrb[52].mxu0 }
 0x83f   :  { %v3088_v25 = vpop.f32.mrb[53].mxu0  ;;  %3312 = vpow2.f32 %v2756_v26  ;;  %v1912_v46 = vadd.f32 %v4037_v42, %v1911_v22  ;;  %v2427_v26 = vpack.c.bf16 %v3706_v36, %v3706_v36  ;;  %v3180_v36 = vld [vmem:[%s4161_s19 + $0x8] sm:$0xff]  }
 0x840   :  { %v1914_v27 = vpop.f32.mrb[54].mxu0  ;;  %3314 = vpow2.f32 %v2757_v29 }
 0x841   :  { %v3089_v8 = vpop.f32.mrb[55].mxu0  ;;  %v1918_v49 = vrot.slane %v1912_v46, 2  ;;  %v1919_v53 = vrot.slane %v1912_v46, 3 }
 0x847   :  { %v3309_v40 = vpop.eup %3308 }
 0x848   :  { %v3311_v5 = vpop.eup %3310  ;;  %v1852_v31 = vadd.f32 1.0, %v3309_v40 }
 0x849   :  { %v1853_v37 = vadd.f32 1.0, %v3311_v5  ;;  %v3313_v38 = vpop.eup %3312 }
 0x84a   :  { %3316 = vrcp.f32 %v1852_v31  ;;  %v3315_v39 = vpop.eup %3314  ;;  %v1871_v47 = vadd.f32 1.0, %v3313_v38 }
 0x84b   :  { %3318 = vrcp.f32 %v1853_v37  ;;  %v1872_v48 = vadd.f32 1.0, %v3315_v39 }
 0x84c   :  { %3320 = vrcp.f32 %v1871_v47 }
 0x84d   :  { %3322 = vrcp.f32 %v1872_v48 }
 0x854   :  { %v3317_v50 = vpop.eup %3316 }
 0x855   :  { %v3319_v54 = vpop.eup %3318  ;;  %v1922_v56 = vmul.f32 %v3317_v50, %v1918_v49 }
 0x856   :  { %v1923_v63 = vmul.f32 %v3319_v54, %v1919_v53  ;;  %v3321_v4 = vpop.eup %3320 }
 0x857   :  { %v1924_v0 = vadd.f32 %v1922_v56, %v3727_v14  ;;  %v3323_v6 = vpop.eup %3322  ;;  %v1928_v9 = vsub.f32 1.0, %v3321_v4  ;;  %v1937_v34 = vmul.f32 %v3321_v4, %v1933_v7 }
 0x858   :  { %v1925_v3 = vadd.f32 %v1923_v63, %v3729_v17  ;;  %v1929_v11 = vsub.f32 1.0, %v3323_v6  ;;  %v1938_v35 = vmul.f32 %v3323_v6, %v1934_v10 }
 0x859   :  { %3324 = vtanh.f32 %v1924_v0 }
 0x85a   :  { %3326 = vtanh.f32 %v1925_v3 }
 0x863   :  { %v3325_v59 = vpop.eup %3324 }
 0x864   :  { %v3327_v51 = vpop.eup %3326  ;;  %v1930_v12 = vmul.f32 %v3325_v59, %v1928_v9 }
 0x865   :  { %v1931_v24 = vmul.f32 %v3327_v51, %v1929_v11 }
 0x866   :  { %v1939_v13 = vadd.f32 %v1937_v34, %v1930_v12 }
 0x867   :  { %v1940_v15 = vadd.f32 %v1938_v35, %v1931_v24 }
 0x868   :  { %v1947_v57 = vrot.slane %v1939_v13, 6 }
 0x869   :  { %v1948_v60 = vrot.slane %v1940_v15, 5 }
 0x86b   :  { %v1949_v62 = vsel %vm122_vm2, %v1948_v60, %v1947_v57 }
 0x86c   :  { %v4046_v41 = vsel %vm1944_vm4, %v1949_v62, %v3994_v2  ;;  %v1952_v44 = vsel %vm1944_vm4, %v1949_v62, 0.0 }
 0x86d   :  { %v1953_v20 = vpack.c.bf16 %v4046_v41, %v4046_v41  ;;  %v2296_v16 = vrot.slane %v1952_v44, %v3805_v58  ;;  %v2131_v60 = vrot.slane %v4046_v41, 1 }
 0x86f   :  { %3095 = vmatmul.mubr.msk.bf16.vlgmr.msra.gmra.mrb[52].mxu1 %vm137_vm3, %v1953_v20  ;;  %v2297_v21 = vcombine.high %v2296_v16, %v2296_v16  ;;  %v2304_v52 = vrot.slane %v2296_v16, %v3805_v58  ;;  %3103 = vmatmul.mubr.msk.bf16.vlgmr.msra.gmra.mrb[56].mxu0 %vm137_vm3, %v1953_v20 }
 0x870   :  { %3107 = vmatpush3.bf16.msra.mxu1 %v3928_v61  ;;  %3115 = vmatpush3.bf16.msra.mxu0 %v3178_v19  ;;  %v2132_v19 = vrot.slane %v4046_v41, 2 }
 0x871   :  { %3108 = vmatprep.subr.bf16.mxu1 %v3383_v1  ;;  %3110 = vmatprep.mubr.msk.bf16.mxu1 %vm3384_vm0, %v3383_v1  ;;  %v2311_v2 = vrot.slane %v2297_v21, %v3805_v58  ;;  %v2388_v22 = vrot.slane %v2304_v52, %v3811_v18 }
 0x872   :  { %3116 = vmatprep.mubr.msk.bf16.mxu0 %vm3384_vm0, %v3383_v1  ;;  %3128 = vmatprep.subr.bf16.mxu0 %v3383_v1 }
 0x873   :  { %v2392_v25 = vrot.slane %v2311_v2, %v3811_v18  ;;  %v4068_v61 = vsel %vm2420_vm5, %v4014_v32, %v2388_v22 }
 0x874   :  { %3109 = vmatpush3.bf16.msra.mxu1 %v3952_v33  ;;  %v3179_v33 = vld [vmem:[%s4161_s19] sm:$0xff]  }
 0x875   :  { %3120 = vmatprep.subr.bf16.mxu1 %v3383_v1  ;;  %v4075_v27 = vsel %vm2420_vm5, %v4020_v30, %v2392_v25 }
 0x877   :  { %3111 = vmatmul.mubr.msk.bf16.vlgmr.msra.gmra.mrb[56].mxu1 %vm137_vm3, %v1953_v20  ;;  %3117 = vmatmul.mubr.msk.bf16.vlgmr.msra.gmra.mrb[60].mxu0 %vm2443_vm6, %v2427_v26 }
 0x878   :  { %3124 = vmatprep.mubr.msk.bf16.mxu1 %vm3384_vm0, %v3383_v1  ;;  %3132 = vmatprep.mubr.msk.bf16.mxu0 %vm3384_vm0, %v3383_v1 }
 0x879   :  { %3121 = vmatpush3.bf16.msra.mxu1 %v3179_v33 }
 0x87a   :  { %3122 = vmatprep.subr.bf16.mxu1 %v3383_v1 }
 0x87d   :  { %3123 = vmatpush3.bf16.msra.mxu1 %v3180_v36 }
 0x942   :  { %v1991_v32 = vpop.f32.mrb[52].mxu1  ;;  %v2031_v30 = vpop.f32.mrb[56].mxu0 }
 0x943   :  { %v2038_v29 = vrot.slane %v1991_v32, 1  ;;  %v2039_v8 = vrot.slane %v1991_v32, 2  ;;  %v2057_v40 = vrot.slane %v2031_v30, 1  ;;  %v2058_v5 = vrot.slane %v2031_v30, 2  ;;  %v3096_v31 = vpop.f32.mrb[53].mxu1  ;;  %v3104_v37 = vpop.f32.mrb[57].mxu0 }
 0x944   :  { %v1994_v38 = vpop.f32.mrb[54].mxu1  ;;  %v2034_v39 = vpop.f32.mrb[58].mxu0 }
 0x945   :  { %v2042_v46 = vadd.f32 %v2038_v29, %v3701_v23  ;;  %v2043_v47 = vadd.f32 %v2039_v8, %v3703_v28  ;;  %v2061_v48 = vadd.f32 %v2057_v40, %v3712_v43  ;;  %v2062_v49 = vadd.f32 %v2058_v5, %v3714_v45  ;;  %v3097_v50 = vpop.f32.mrb[55].mxu1  ;;  %v3105_v53 = vpop.f32.mrb[59].mxu0 }
 0x946   :  { %v2141_v8 = vpop.permute.xlu1 %2140  ;;  %v3181_v50 = vld [vmem:[%s4164_s22] sm:$0xff]   ;;  %v3182_v53 = vld [vmem:[%s4164_s22 + $0x8] sm:$0xff]  }
 0x947   :  { %v2761_v54 = vmul.f32 -1.442695, %v2042_v46  ;;  %v2762_v56 = vmul.f32 -1.442695, %v2043_v47  ;;  %v2763_v63 = vmul.f32 -1.442695, %v2061_v48  ;;  %3129 = vmatpush3.bf16.msra.mxu0 %v3181_v50 }
 0x948   :  { %v2764_v0 = vmul.f32 -1.442695, %v2062_v49  ;;  %vm2142_vm0 = vcmp.eq.s32.totalorder %v2141_v8, 1  ;;  %3130 = vmatprep.subr.bf16.mxu0 %v3383_v1 }
 0x949   :  { %3328 = vpow2.f32 %v2761_v54 }
 0x94a   :  { %3330 = vpow2.f32 %v2762_v56  ;;  %v2109_v3 = vpop.f32.mrb[56].mxu1  ;;  %v4093_v4 = vpop.f32.mrb[60].mxu0 }
 0x94b   :  { %3332 = vpow2.f32 %v2763_v63  ;;  %v3112_v6 = vpop.f32.mrb[57].mxu1  ;;  %v3118_v23 = vpop.f32.mrb[61].mxu0  ;;  %v2110_v24 = vadd.f32 %v4037_v42, %v2109_v3  ;;  %3131 = vmatpush3.bf16.msra.mxu0 %v3182_v53 }
 0x94c   :  { %3334 = vpow2.f32 %v2764_v0  ;;  %v2112_v28 = vpop.f32.mrb[58].mxu1  ;;  %v2484_v7 = vpop.f32.mrb[62].mxu0 }
 0x94d   :  { %v3113_v43 = vpop.f32.mrb[59].mxu1  ;;  %v3119_v9 = vpop.f32.mrb[63].mxu0  ;;  %v2116_v13 = vrot.slane %v2110_v24, 1  ;;  %v2117_v55 = vrot.slane %v2110_v24, 2 }
 0x953   :  { %v3329_v45 = vpop.eup %3328 }
 0x954   :  { %v3331_v59 = vpop.eup %3330  ;;  %v2050_v10 = vadd.f32 1.0, %v3329_v45 }
 0x955   :  { %v3333_v11 = vpop.eup %3332  ;;  %v2051_v51 = vadd.f32 1.0, %v3331_v59 }
 0x956   :  { %v3335_v34 = vpop.eup %3334  ;;  %3336 = vrcp.f32 %v2050_v10  ;;  %v2069_v12 = vadd.f32 1.0, %v3333_v11 }
 0x957   :  { %3338 = vrcp.f32 %v2051_v51  ;;  %v2070_v35 = vadd.f32 1.0, %v3335_v34 }
 0x958   :  { %3340 = vrcp.f32 %v2069_v12 }
 0x959   :  { %3342 = vrcp.f32 %v2070_v35 }
 0x960   :  { %v3337_v15 = vpop.eup %3336 }
 0x961   :  { %v3339_v57 = vpop.eup %3338  ;;  %v2120_v62 = vmul.f32 %v3337_v15, %v2116_v13 }
 0x962   :  { %v3341_v44 = vpop.eup %3340  ;;  %v2121_v20 = vmul.f32 %v3339_v57, %v2117_v55 }
 0x963   :  { %v3343_v16 = vpop.eup %3342  ;;  %v2135_v21 = vmul.f32 %v3341_v44, %v2131_v60  ;;  %v2122_v52 = vadd.f32 %v2120_v62, %v3727_v14  ;;  %v2126_v42 = vsub.f32 1.0, %v3341_v44 }
 0x964   :  { %v2136_v2 = vmul.f32 %v3343_v16, %v2132_v19  ;;  %v2123_v22 = vadd.f32 %v2121_v20, %v3729_v17  ;;  %v2127_v26 = vsub.f32 1.0, %v3343_v16 }
 0x965   :  { %3344 = vtanh.f32 %v2122_v52 }
 0x966   :  { %3346 = vtanh.f32 %v2123_v22 }
 0x96f   :  { %v3345_v25 = vpop.eup %3344 }
 0x970   :  { %v3347_v33 = vpop.eup %3346  ;;  %v2128_v36 = vmul.f32 %v3345_v25, %v2126_v42 }
 0x971   :  { %v2129_v32 = vmul.f32 %v3347_v33, %v2127_v26 }
 0x972   :  { %v2137_v30 = vadd.f32 %v2135_v21, %v2128_v36 }
 0x973   :  { %v2138_v29 = vadd.f32 %v2136_v2, %v2129_v32 }
 0x974   :  { %v2145_v41 = vrot.slane %v2137_v30, 7 }
 0x975   :  { %v2146_v40 = vrot.slane %v2138_v29, 6 }
 0x977   :  { %v2147_v5 = vsel %vm122_vm2, %v2146_v40, %v2145_v41 }
 0x978   :  { %v2149_v14 = vsel %vm2142_vm0, %v2147_v5, 0.0 }
 0x979   :  { %v2319_v31 = vrot.slane %v2149_v14, %v3805_v58 }
 0x97b   :  { %v2320_v17 = vcombine.high %v2319_v31, %v2319_v31  ;;  %v2327_v37 = vrot.slane %v2319_v31, %v3805_v58 }
 0x97d   :  { %v2334_v38 = vrot.slane %v2320_v17, %v3805_v58  ;;  %v2398_v39 = vrot.slane %v2327_v37, %v3811_v18 }
 0x97f   :  { %v2402_v46 = vrot.slane %v2334_v38, %v3811_v18  ;;  %v2424_v47 = vsel %vm2423_vm7, %v4068_v61, %v2398_v39  ;;  %v2766_v61 = vld [vmem:[%s4163_s21] ss:$0 sm:$0xff] }
 0x981   :  { %v2425_v48 = vsel %vm2423_vm7, %v4075_v27, %v2402_v46  ;;  %v2482_v27 = vadd.f32 %v2766_v61, %v4093_v4 }
 0x982   :  { %v2426_v49 = vpack.c.bf16 %v2425_v48, %v2424_v47 }
 0x983   :  { %v2554_v54 = vrot.slane %v2482_v27, %v3805_v58 }
 0x984   :  { %3125 = vmatmul.mubr.msk.bf16.vlgmr.msra.gmra.mrb[60].mxu1 %vm137_vm3, %v2426_v49 }
 0x985   :  { %v2555_v56 = vcombine.high %v2554_v54, %v2554_v54  ;;  %v2562_v63 = vrot.slane %v2554_v54, %v3805_v58 }
 0x987   :  { %v2569_v0 = vrot.slane %v2555_v56, %v3805_v58  ;;  %v2573_v3 = vrot.slane %v2562_v63, %v3811_v18  ;;  %v2772_v58 = vld [vmem:[%s4165_s23] ss:$0 sm:$0xff] }
 0x989   :  { %v2577_v1 = vrot.slane %v2569_v0, %v3811_v18 }
 0xa57   :  { %v2540_v6 = vpop.f32.mrb[60].mxu1 }
 0xa58   :  { %v2580_v23 = vadd.f32 %v2573_v3, %v2540_v6  ;;  %v3126_v28 = vpop.f32.mrb[61].mxu1 }
 0xa59   :  { %v2543_v7 = vpop.f32.mrb[62].mxu1 }
 0xa5a   :  { %v2581_v43 = vadd.f32 %v2577_v1, %v2543_v7  ;;  %v3127_v9 = vpop.f32.mrb[63].mxu1  ;;  %3348 = vtanh.f32 %v2580_v23 }
 0xa5c   :  { %3350 = vtanh.f32 %v2581_v43 }
 0xa64   :  { %v3349_v4 = vpop.eup %3348 }
 0xa66   :  { %v3351_v45 = vpop.eup %3350 }
 0xa67   :  { %v2584_v59 = vpack.c.bf16 %v3351_v45, %v3349_v4 }
 0xa69   :  { %2585 = vst.msk [vmem:[#allocation2] sm:$0xff] %vm137_vm3, %v2584_v59 }
 0xa70   :  { %v2586_v10 = vld [vmem:[#allocation2] sm:$0xff] }
 0xa71   :  { %3133 = vmatmul.mubr.msk.bf16.vlgmr.msra.gmra.mrb[64].mxu0 %vm137_vm3, %v2586_v10 }
 0xb44   :  { %v2648_v11 = vpop.f32.mrb[64].mxu0 }
 0xb45   :  { %v2649_v18 = vadd.f32 %v2772_v58, %v2648_v11  ;;  %v3134_v51 = vpop.f32.mrb[65].mxu0 }
 0xb46   :  { %v2651_v34 = vpop.f32.mrb[66].mxu0 }
 0xb47   :  { %2655 = vst [vmem:[#allocation3] sm:$0xff] %v2649_v18  ;;  %v2652_v12 = vadd.f32 %v2772_v58, %v2651_v34  ;;  %v3135_v35 = vpop.f32.mrb[67].mxu0 }
 0xb49   :  { %2656 = vst [vmem:[#allocation3 + $0x8] sm:$0xff] %v2652_v12 }
 0xb4a   :  { %3370 = shalt.err (!%p3367_p4)
}
 0xb4b   :  { %s3371_s0 = scalar_lea.hbm %s4166_s24, 256 }
 0xb4c   :  { %p3372_p5 = scmp.ne.s32.totalorder %s4166_s24, %s3371_s0  ;;  %p3375_p6 = scmp.lt.u32.totalorder %s3371_s0, %s4166_s24 }
 0xb4e   :  { %p3377_p7 = pnand %p3375_p6, %p3372_p5 }
 0xb50   :  { %3380 = shalt.err (!%p3377_p7)
}
 0xb51   :  { %s3395_s14 = smov 128   ;;  %s3396_s10 = smov 8  }
 0xb52   :  { %2668 = dma.vmem_to_hbm [thread:$0]  %s2663_s17, 256, %s4166_s24, [#allocation4], %s3395_s14, %s3395_s14, %s3396_s10  }
 0xb53   :  { %3381 = dma.done.wait [#allocation4], 256  }
 0xb54   :  { %3382 = vsyncadd [#allocation4], 4294967040 }
 0xb55   :  { %2680 = vsyncpa [#allocation4], 1 }

</bundles_post_ra>
